<compile_context>
chip_gen: v7x
topology: tpu7x:2x2x1
jax: 0.10.0
libtpu: 0.0.40
codegen_flags: <defaults>
</compile_context>

<pallas_src>
import jax
import jax.numpy as jnp
import numpy as np
from jax import lax
from jax.experimental import pallas as pl
from jax.experimental.pallas import tpu as pltpu

EPS = 1e-5
_SUBLANE = 8


def _round_up(v, m):
    return (v + m - 1) // m * m


def _tap_masks_and_shifts(N, H, W):
    """0/1 border masks + lane-roll amounts for the 9 conv taps.

    Activations inside the kernel are (C, M) with M = N*H*W flattened row-major
    over (n, y, x).  For tap (dy, dx) the contributing input pixel of output
    position p is p + (dy-1)*W + (dx-1); a lane rotation by
    r = -((dy-1)*W + (dx-1)) mod M brings it to position p, and the mask zeroes
    positions whose neighbour falls outside the HxW image ("same" padding).
    """
    M = N * H * W
    yy, xx = np.meshgrid(np.arange(H), np.arange(W), indexing="ij")
    yy = np.tile(yy[None], (N, 1, 1)).reshape(M)
    xx = np.tile(xx[None], (N, 1, 1)).reshape(M)
    masks = np.zeros((9, M), np.float32)
    shifts = []
    t = 0
    for dy in range(3):
        for dx in range(3):
            oy, ox = dy - 1, dx - 1
            valid = ((yy + oy >= 0) & (yy + oy < H) &
                     (xx + ox >= 0) & (xx + ox < W))
            masks[t] = valid.astype(np.float32)
            shifts.append(int((-(oy * W + ox)) % M))
            t += 1
    return jnp.asarray(masks), tuple(shifts)


# ------------------------------ fused kernel ------------------------------- #
def _make_fused_kernel(n_layers, shifts):
    def kernel(mask_ref, x_ref, *refs):
        o_ref = refs[-1]
        layer_refs = refs[:-1]

        x = x_ref[...]                              # (Cin_pad, M) f32, lane-dense
        for l in range(n_layers):
            w_ref = layer_refs[3 * l]               # (Cout_pad, 9*Cin_pad)
            g_ref = layer_refs[3 * l + 1]           # (Cout_pad, 1)  gamma
            bt_ref = layer_refs[3 * l + 2]          # (Cout_pad, 1)  beta

            # im2col via 9 lane rotations (XLU) + border masks (VPU), then one
            # MXU matmul with K = 9*Cin.
            taps = []
            for t in range(9):
                r = shifts[t]
                if r == 0:                          # centre tap: mask is all-ones
                    taps.append(x)
                else:
                    taps.append(pltpu.roll(x, shift=r, axis=1) *
                                mask_ref[t:t + 1, :])
            patches = jnp.concatenate(taps, axis=0)            # (9*Cin, M)
            out = jnp.dot(w_ref[...], patches,
                          preferred_element_type=jnp.float32)  # (Cout, M)

            # Training-mode BatchNorm folded into one FMA, then ReLU.
            # (conv bias is exactly cancelled by the mean subtraction.)
            m = out.shape[1]
            mean = jnp.sum(out, axis=1, keepdims=True) * (1.0 / m)
            cent = out - mean
            var = jnp.sum(cent * cent, axis=1, keepdims=True) * (1.0 / m)
            scale = g_ref[...] * lax.rsqrt(var + EPS)
            shift = bt_ref[...] - mean * scale
            x = jnp.maximum(out * scale + shift, 0.0)

        o_ref[...] = x.astype(o_ref.dtype)          # lane-dense (Cout_pad, M) store

    return kernel


# --------------------------------- wrapper ---------------------------------- #
def conv_relu_chain(x_nhwc, params):
    """Chain of (conv3x3 'same' + BN(train) + ReLU) blocks, one fused kernel."""
    N, H, W, Cin = x_nhwc.shape
    n_layers = len(params)
    M = N * H * W
    Cout_last = params[-1]["w"].shape[-1]

    masks, shifts = _tap_masks_and_shifts(N, H, W)

    # Wrapper-side layout plumbing: channel-major, spatially flattened, channel
    # dim zero-padded to a sublane multiple so im2col concat stays aligned.
    c_run = _round_up(Cin, _SUBLANE)
    x_cm = jnp.transpose(x_nhwc, (3, 0, 1, 2)).reshape(Cin, M).astype(jnp.float32)
    if c_run != Cin:
        x_cm = jnp.pad(x_cm, ((0, c_run - Cin), (0, 0)))

    inputs = [masks, x_cm]
    in_specs = [pl.BlockSpec((9, M), lambda i: (0, 0)),
                pl.BlockSpec((c_run, M), lambda i: (0, 0))]

    co_pad = c_run
    for layer in params:
        w = layer["w"]                              # (3, 3, ci, co) HWIO
        ci, co = w.shape[2], w.shape[3]
        ci_pad = c_run                              # channels carried by activation
        co_pad = _round_up(co, _SUBLANE)
        # Zero-pad in/out channels (padded out-channels get gamma=beta=0, so
        # they stay exactly zero and feed zero weights into the next layer).
        w_p = jnp.pad(w.astype(jnp.float32),
                      ((0, 0), (0, 0), (0, ci_pad - ci), (0, co_pad - co)))
        w_mat = jnp.transpose(w_p, (3, 0, 1, 2)).reshape(co_pad, 9 * ci_pad)
        gamma = jnp.pad(layer["gamma"].astype(jnp.float32),
                        (0, co_pad - co)).reshape(co_pad, 1)
        beta = jnp.pad(layer["beta"].astype(jnp.float32),
                       (0, co_pad - co)).reshape(co_pad, 1)
        inputs += [w_mat, gamma, beta]
        in_specs += [pl.BlockSpec((co_pad, 9 * ci_pad), lambda i: (0, 0)),
                     pl.BlockSpec((co_pad, 1), lambda i: (0, 0)),
                     pl.BlockSpec((co_pad, 1), lambda i: (0, 0))]
        c_run = co_pad

    out_cm = pl.pallas_call(
        _make_fused_kernel(n_layers, shifts),
        out_shape=jax.ShapeDtypeStruct((co_pad, M), jnp.float32),
        grid=(1,),
        in_specs=in_specs,
        out_specs=pl.BlockSpec((co_pad, M), lambda i: (0, 0)),
        compiler_params=pltpu.CompilerParams(
            dimension_semantics=("arbitrary",)),
    )(*inputs)

    out = out_cm[:Cout_last].reshape(Cout_last, N, H, W)
    return jnp.transpose(out, (1, 2, 3, 0)).astype(x_nhwc.dtype)


# --------------------------- pure-JAX reference ----------------------------- #
def _ref_block(x, w, b, gamma, beta):
    y = lax.conv_general_dilated(
        x, w, window_strides=(1, 1), padding="SAME",
        dimension_numbers=("NHWC", "HWIO", "NHWC"),
    ) + b[None, None, None, :]
    mean = jnp.mean(y, axis=(0, 1, 2), keepdims=True)
    var = jnp.mean((y - mean) ** 2, axis=(0, 1, 2), keepdims=True)
    y = (y - mean) * lax.rsqrt(var + EPS) * gamma + beta
    return jnp.maximum(y, 0.0)


def conv_relu_chain_ref(x_nhwc, params):
    x = x_nhwc
    for layer in params:
        x = _ref_block(x, layer["w"], layer["b"], layer["gamma"], layer["beta"])
    return x


# ---------------------------------- params ---------------------------------- #
def make_params(key, cin, cout, n_layers=4):
    params = []
    for li in range(n_layers):
        k = jax.random.fold_in(key, li)
        kw, kb, kg, ke = jax.random.split(k, 4)
        ci = cin if li == 0 else cout
        params.append({
            "w": 0.2 * jax.random.normal(kw, (3, 3, ci, cout), jnp.float32),
            "b": 0.1 * jax.random.normal(kb, (cout,), jnp.float32),
            "gamma": 1.0 + 0.1 * jax.random.normal(kg, (cout,), jnp.float32),
            "beta": 0.1 * jax.random.normal(ke, (cout,), jnp.float32),
        })
    return params


# ----------------------------------- main ------------------------------------ #
if __name__ == "__main__":
    key = jax.random.PRNGKey(0)
    kx, kp = jax.random.split(key)

    N, Cin, H, W, Cout = 2, 4, 16, 16, 8
    x_nchw = jax.random.normal(kx, (N, Cin, H, W), jnp.float32)   # PyTorch NCHW
    x_nhwc = jnp.transpose(x_nchw, (0, 2, 3, 1))                  # kernel layout

    params = make_params(kp, Cin, Cout)

    fwd = jax.jit(conv_relu_chain)
    y = jax.block_until_ready(fwd(x_nhwc, params))

    y_ref = conv_relu_chain_ref(x_nhwc, params)
    np.testing.assert_allclose(np.asarray(y), np.asarray(y_ref),
                               atol=1e-2, rtol=1e-2)
    print("KERNEL_OK")
</pallas_src>

<mosaic_0001>
module attributes {stable_mosaic.version = 11 : i64} {
  func.func @kernel(%arg0: i32, %arg1: memref<9x512xf32, #tpu.memory_space<vmem>>, %arg2: memref<8x512xf32, #tpu.memory_space<vmem>>, %arg3: memref<8x72xf32, #tpu.memory_space<vmem>>, %arg4: memref<8x1xf32, #tpu.memory_space<vmem>>, %arg5: memref<8x1xf32, #tpu.memory_space<vmem>>, %arg6: memref<8x72xf32, #tpu.memory_space<vmem>>, %arg7: memref<8x1xf32, #tpu.memory_space<vmem>>, %arg8: memref<8x1xf32, #tpu.memory_space<vmem>>, %arg9: memref<8x72xf32, #tpu.memory_space<vmem>>, %arg10: memref<8x1xf32, #tpu.memory_space<vmem>>, %arg11: memref<8x1xf32, #tpu.memory_space<vmem>>, %arg12: memref<8x72xf32, #tpu.memory_space<vmem>>, %arg13: memref<8x1xf32, #tpu.memory_space<vmem>>, %arg14: memref<8x1xf32, #tpu.memory_space<vmem>>, %arg15: memref<8x512xf32, #tpu.memory_space<vmem>>) attributes {dimension_semantics = [#tpu.dimension_semantics<arbitrary>], iteration_bounds = array<i64: 1>, scalar_prefetch = 0 : i64, scratch_operands = 0 : i64, tpu.core_type = #tpu.core_type<tc>, window_params = [{pipeline_mode = #tpu.pipeline_mode<synchronous>, transform_indices = @transform_0, window_bounds = array<i64: 9, 512>}, {pipeline_mode = #tpu.pipeline_mode<synchronous>, transform_indices = @transform_1, window_bounds = array<i64: 8, 512>}, {pipeline_mode = #tpu.pipeline_mode<synchronous>, transform_indices = @transform_2, window_bounds = array<i64: 8, 72>}, {pipeline_mode = #tpu.pipeline_mode<synchronous>, transform_indices = @transform_3, window_bounds = array<i64: 8, 1>}, {pipeline_mode = #tpu.pipeline_mode<synchronous>, transform_indices = @transform_4, window_bounds = array<i64: 8, 1>}, {pipeline_mode = #tpu.pipeline_mode<synchronous>, transform_indices = @transform_5, window_bounds = array<i64: 8, 72>}, {pipeline_mode = #tpu.pipeline_mode<synchronous>, transform_indices = @transform_6, window_bounds = array<i64: 8, 1>}, {pipeline_mode = #tpu.pipeline_mode<synchronous>, transform_indices = @transform_7, window_bounds = array<i64: 8, 1>}, {pipeline_mode = #tpu.pipeline_mode<synchronous>, transform_indices = @transform_8, window_bounds = array<i64: 8, 72>}, {pipeline_mode = #tpu.pipeline_mode<synchronous>, transform_indices = @transform_9, window_bounds = array<i64: 8, 1>}, {pipeline_mode = #tpu.pipeline_mode<synchronous>, transform_indices = @transform_10, window_bounds = array<i64: 8, 1>}, {pipeline_mode = #tpu.pipeline_mode<synchronous>, transform_indices = @transform_11, window_bounds = array<i64: 8, 72>}, {pipeline_mode = #tpu.pipeline_mode<synchronous>, transform_indices = @transform_12, window_bounds = array<i64: 8, 1>}, {pipeline_mode = #tpu.pipeline_mode<synchronous>, transform_indices = @transform_13, window_bounds = array<i64: 8, 1>}, {pipeline_mode = #tpu.pipeline_mode<synchronous>, transform_indices = @transform_14, window_bounds = array<i64: 8, 512>}]} {
    %c0 = arith.constant 0 : index
    %c0_0 = arith.constant 0 : index
    %0 = vector.load %arg2[%c0, %c0_0] : memref<8x512xf32, #tpu.memory_space<vmem>>, vector<8x512xf32>
    %c17_i32 = arith.constant 17 : i32
    %1 = tpu.dynamic_rotate %0 by %c17_i32 dim 1 : vector<8x512xf32>, i32 -> vector<8x512xf32>
    %c0_1 = arith.constant 0 : index
    %c0_2 = arith.constant 0 : index
    %2 = vector.load %arg1[%c0_1, %c0_2] : memref<9x512xf32, #tpu.memory_space<vmem>>, vector<1x512xf32>
    %3 = vector.broadcast %2 : vector<1x512xf32> to vector<8x512xf32>
    %4 = arith.mulf %1, %3 : vector<8x512xf32>
    %c16_i32 = arith.constant 16 : i32
    %5 = tpu.dynamic_rotate %0 by %c16_i32 dim 1 : vector<8x512xf32>, i32 -> vector<8x512xf32>
    %c1 = arith.constant 1 : index
    %c0_3 = arith.constant 0 : index
    %6 = vector.load %arg1[%c1, %c0_3] : memref<9x512xf32, #tpu.memory_space<vmem>>, vector<1x512xf32>
    %7 = vector.broadcast %6 : vector<1x512xf32> to vector<8x512xf32>
    %8 = arith.mulf %5, %7 : vector<8x512xf32>
    %c15_i32 = arith.constant 15 : i32
    %9 = tpu.dynamic_rotate %0 by %c15_i32 dim 1 : vector<8x512xf32>, i32 -> vector<8x512xf32>
    %c2 = arith.constant 2 : index
    %c0_4 = arith.constant 0 : index
    %10 = vector.load %arg1[%c2, %c0_4] : memref<9x512xf32, #tpu.memory_space<vmem>>, vector<1x512xf32>
    %11 = vector.broadcast %10 : vector<1x512xf32> to vector<8x512xf32>
    %12 = arith.mulf %9, %11 : vector<8x512xf32>
    %c1_i32 = arith.constant 1 : i32
    %13 = tpu.dynamic_rotate %0 by %c1_i32 dim 1 : vector<8x512xf32>, i32 -> vector<8x512xf32>
    %c3 = arith.constant 3 : index
    %c0_5 = arith.constant 0 : index
    %14 = vector.load %arg1[%c3, %c0_5] : memref<9x512xf32, #tpu.memory_space<vmem>>, vector<1x512xf32>
    %15 = vector.broadcast %14 : vector<1x512xf32> to vector<8x512xf32>
    %16 = arith.mulf %13, %15 : vector<8x512xf32>
    %c511_i32 = arith.constant 511 : i32
    %17 = tpu.dynamic_rotate %0 by %c511_i32 dim 1 : vector<8x512xf32>, i32 -> vector<8x512xf32>
    %c5 = arith.constant 5 : index
    %c0_6 = arith.constant 0 : index
    %18 = vector.load %arg1[%c5, %c0_6] : memref<9x512xf32, #tpu.memory_space<vmem>>, vector<1x512xf32>
    %19 = vector.broadcast %18 : vector<1x512xf32> to vector<8x512xf32>
    %20 = arith.mulf %17, %19 : vector<8x512xf32>
    %c497_i32 = arith.constant 497 : i32
    %21 = tpu.dynamic_rotate %0 by %c497_i32 dim 1 : vector<8x512xf32>, i32 -> vector<8x512xf32>
    %c6 = arith.constant 6 : index
    %c0_7 = arith.constant 0 : index
    %22 = vector.load %arg1[%c6, %c0_7] : memref<9x512xf32, #tpu.memory_space<vmem>>, vector<1x512xf32>
    %23 = vector.broadcast %22 : vector<1x512xf32> to vector<8x512xf32>
    %24 = arith.mulf %21, %23 : vector<8x512xf32>
    %c496_i32 = arith.constant 496 : i32
    %25 = tpu.dynamic_rotate %0 by %c496_i32 dim 1 : vector<8x512xf32>, i32 -> vector<8x512xf32>
    %c7 = arith.constant 7 : index
    %c0_8 = arith.constant 0 : index
    %26 = vector.load %arg1[%c7, %c0_8] : memref<9x512xf32, #tpu.memory_space<vmem>>, vector<1x512xf32>
    %27 = vector.broadcast %26 : vector<1x512xf32> to vector<8x512xf32>
    %28 = arith.mulf %25, %27 : vector<8x512xf32>
    %c495_i32 = arith.constant 495 : i32
    %29 = tpu.dynamic_rotate %0 by %c495_i32 dim 1 : vector<8x512xf32>, i32 -> vector<8x512xf32>
    %c8 = arith.constant 8 : index
    %c0_9 = arith.constant 0 : index
    %30 = vector.load %arg1[%c8, %c0_9] : memref<9x512xf32, #tpu.memory_space<vmem>>, vector<1x512xf32>
    %31 = vector.broadcast %30 : vector<1x512xf32> to vector<8x512xf32>
    %32 = arith.mulf %29, %31 : vector<8x512xf32>
    %33 = tpu.concatenate %4, %8, %12, %16, %0, %20, %24, %28, %32 in 0 : vector<8x512xf32>, vector<8x512xf32>, vector<8x512xf32>, vector<8x512xf32>, vector<8x512xf32>, vector<8x512xf32>, vector<8x512xf32>, vector<8x512xf32>, vector<8x512xf32> -> vector<72x512xf32>
    %c0_10 = arith.constant 0 : index
    %c0_11 = arith.constant 0 : index
    %34 = vector.load %arg3[%c0_10, %c0_11] : memref<8x72xf32, #tpu.memory_space<vmem>>, vector<8x72xf32>
    %cst = arith.constant dense<0.000000e+00> : vector<8x512xf32>
    %35 = tpu.matmul %34, %33, %cst {dimension_numbers = #tpu.dot_dimension_numbers<[1], [0], [0], [1], [0, 0, 1, 1], [], []>} : vector<8x72xf32>, vector<72x512xf32>, vector<8x512xf32> -> vector<8x512xf32>
    %cst_12 = arith.constant dense<0.000000e+00> : vector<8xf32>
    %36 = vector.multi_reduction <add>, %35, %cst_12 [1] : vector<8x512xf32> to vector<8xf32>
    %37 = vector.shape_cast %36 : vector<8xf32> to vector<8x1xf32>
    %cst_13 = arith.constant 0.001953125 : f32
    %38 = vector.broadcast %cst_13 : f32 to vector<8x1xf32>
    %39 = arith.mulf %37, %38 : vector<8x1xf32>
    %40 = vector.broadcast %39 : vector<8x1xf32> to vector<8x512xf32>
    %41 = arith.subf %35, %40 : vector<8x512xf32>
    %42 = arith.mulf %41, %41 : vector<8x512xf32>
    %cst_14 = arith.constant dense<0.000000e+00> : vector<8xf32>
    %43 = vector.multi_reduction <add>, %42, %cst_14 [1] : vector<8x512xf32> to vector<8xf32>
    %44 = vector.shape_cast %43 : vector<8xf32> to vector<8x1xf32>
    %cst_15 = arith.constant 0.001953125 : f32
    %45 = vector.broadcast %cst_15 : f32 to vector<8x1xf32>
    %46 = arith.mulf %44, %45 : vector<8x1xf32>
    %c0_16 = arith.constant 0 : index
    %c0_17 = arith.constant 0 : index
    %47 = vector.load %arg4[%c0_16, %c0_17] : memref<8x1xf32, #tpu.memory_space<vmem>>, vector<8x1xf32>
    %cst_18 = arith.constant 9.99999974E-6 : f32
    %48 = vector.broadcast %cst_18 : f32 to vector<8x1xf32>
    %49 = arith.addf %46, %48 : vector<8x1xf32>
    %50 = math.rsqrt %49 : vector<8x1xf32>
    %51 = arith.mulf %47, %50 : vector<8x1xf32>
    %c0_19 = arith.constant 0 : index
    %c0_20 = arith.constant 0 : index
    %52 = vector.load %arg5[%c0_19, %c0_20] : memref<8x1xf32, #tpu.memory_space<vmem>>, vector<8x1xf32>
    %53 = arith.mulf %39, %51 : vector<8x1xf32>
    %54 = arith.subf %52, %53 : vector<8x1xf32>
    %55 = vector.broadcast %51 : vector<8x1xf32> to vector<8x512xf32>
    %56 = arith.mulf %35, %55 : vector<8x512xf32>
    %57 = vector.broadcast %54 : vector<8x1xf32> to vector<8x512xf32>
    %58 = arith.addf %56, %57 : vector<8x512xf32>
    %cst_21 = arith.constant 0.000000e+00 : f32
    %59 = vector.broadcast %cst_21 : f32 to vector<8x512xf32>
    %60 = arith.maximumf %58, %59 : vector<8x512xf32>
    %c17_i32_22 = arith.constant 17 : i32
    %61 = tpu.dynamic_rotate %60 by %c17_i32_22 dim 1 : vector<8x512xf32>, i32 -> vector<8x512xf32>
    %c0_23 = arith.constant 0 : index
    %c0_24 = arith.constant 0 : index
    %62 = vector.load %arg1[%c0_23, %c0_24] : memref<9x512xf32, #tpu.memory_space<vmem>>, vector<1x512xf32>
    %63 = vector.broadcast %62 : vector<1x512xf32> to vector<8x512xf32>
    %64 = arith.mulf %61, %63 : vector<8x512xf32>
    %c16_i32_25 = arith.constant 16 : i32
    %65 = tpu.dynamic_rotate %60 by %c16_i32_25 dim 1 : vector<8x512xf32>, i32 -> vector<8x512xf32>
    %c1_26 = arith.constant 1 : index
    %c0_27 = arith.constant 0 : index
    %66 = vector.load %arg1[%c1_26, %c0_27] : memref<9x512xf32, #tpu.memory_space<vmem>>, vector<1x512xf32>
    %67 = vector.broadcast %66 : vector<1x512xf32> to vector<8x512xf32>
    %68 = arith.mulf %65, %67 : vector<8x512xf32>
    %c15_i32_28 = arith.constant 15 : i32
    %69 = tpu.dynamic_rotate %60 by %c15_i32_28 dim 1 : vector<8x512xf32>, i32 -> vector<8x512xf32>
    %c2_29 = arith.constant 2 : index
    %c0_30 = arith.constant 0 : index
    %70 = vector.load %arg1[%c2_29, %c0_30] : memref<9x512xf32, #tpu.memory_space<vmem>>, vector<1x512xf32>
    %71 = vector.broadcast %70 : vector<1x512xf32> to vector<8x512xf32>
    %72 = arith.mulf %69, %71 : vector<8x512xf32>
    %c1_i32_31 = arith.constant 1 : i32
    %73 = tpu.dynamic_rotate %60 by %c1_i32_31 dim 1 : vector<8x512xf32>, i32 -> vector<8x512xf32>
    %c3_32 = arith.constant 3 : index
    %c0_33 = arith.constant 0 : index
    %74 = vector.load %arg1[%c3_32, %c0_33] : memref<9x512xf32, #tpu.memory_space<vmem>>, vector<1x512xf32>
    %75 = vector.broadcast %74 : vector<1x512xf32> to vector<8x512xf32>
    %76 = arith.mulf %73, %75 : vector<8x512xf32>
    %c511_i32_34 = arith.constant 511 : i32
    %77 = tpu.dynamic_rotate %60 by %c511_i32_34 dim 1 : vector<8x512xf32>, i32 -> vector<8x512xf32>
    %c5_35 = arith.constant 5 : index
    %c0_36 = arith.constant 0 : index
    %78 = vector.load %arg1[%c5_35, %c0_36] : memref<9x512xf32, #tpu.memory_space<vmem>>, vector<1x512xf32>
    %79 = vector.broadcast %78 : vector<1x512xf32> to vector<8x512xf32>
    %80 = arith.mulf %77, %79 : vector<8x512xf32>
    %c497_i32_37 = arith.constant 497 : i32
    %81 = tpu.dynamic_rotate %60 by %c497_i32_37 dim 1 : vector<8x512xf32>, i32 -> vector<8x512xf32>
    %c6_38 = arith.constant 6 : index
    %c0_39 = arith.constant 0 : index
    %82 = vector.load %arg1[%c6_38, %c0_39] : memref<9x512xf32, #tpu.memory_space<vmem>>, vector<1x512xf32>
    %83 = vector.broadcast %82 : vector<1x512xf32> to vector<8x512xf32>
    %84 = arith.mulf %81, %83 : vector<8x512xf32>
    %c496_i32_40 = arith.constant 496 : i32
    %85 = tpu.dynamic_rotate %60 by %c496_i32_40 dim 1 : vector<8x512xf32>, i32 -> vector<8x512xf32>
    %c7_41 = arith.constant 7 : index
    %c0_42 = arith.constant 0 : index
    %86 = vector.load %arg1[%c7_41, %c0_42] : memref<9x512xf32, #tpu.memory_space<vmem>>, vector<1x512xf32>
    %87 = vector.broadcast %86 : vector<1x512xf32> to vector<8x512xf32>
    %88 = arith.mulf %85, %87 : vector<8x512xf32>
    %c495_i32_43 = arith.constant 495 : i32
    %89 = tpu.dynamic_rotate %60 by %c495_i32_43 dim 1 : vector<8x512xf32>, i32 -> vector<8x512xf32>
    %c8_44 = arith.constant 8 : index
    %c0_45 = arith.constant 0 : index
    %90 = vector.load %arg1[%c8_44, %c0_45] : memref<9x512xf32, #tpu.memory_space<vmem>>, vector<1x512xf32>
    %91 = vector.broadcast %90 : vector<1x512xf32> to vector<8x512xf32>
    %92 = arith.mulf %89, %91 : vector<8x512xf32>
    %93 = tpu.concatenate %64, %68, %72, %76, %60, %80, %84, %88, %92 in 0 : vector<8x512xf32>, vector<8x512xf32>, vector<8x512xf32>, vector<8x512xf32>, vector<8x512xf32>, vector<8x512xf32>, vector<8x512xf32>, vector<8x512xf32>, vector<8x512xf32> -> vector<72x512xf32>
    %c0_46 = arith.constant 0 : index
    %c0_47 = arith.constant 0 : index
    %94 = vector.load %arg6[%c0_46, %c0_47] : memref<8x72xf32, #tpu.memory_space<vmem>>, vector<8x72xf32>
    %cst_48 = arith.constant dense<0.000000e+00> : vector<8x512xf32>
    %95 = tpu.matmul %94, %93, %cst_48 {dimension_numbers = #tpu.dot_dimension_numbers<[1], [0], [0], [1], [0, 0, 1, 1], [], []>} : vector<8x72xf32>, vector<72x512xf32>, vector<8x512xf32> -> vector<8x512xf32>
    %cst_49 = arith.constant dense<0.000000e+00> : vector<8xf32>
    %96 = vector.multi_reduction <add>, %95, %cst_49 [1] : vector<8x512xf32> to vector<8xf32>
    %97 = vector.shape_cast %96 : vector<8xf32> to vector<8x1xf32>
    %cst_50 = arith.constant 0.001953125 : f32
    %98 = vector.broadcast %cst_50 : f32 to vector<8x1xf32>
    %99 = arith.mulf %97, %98 : vector<8x1xf32>
    %100 = vector.broadcast %99 : vector<8x1xf32> to vector<8x512xf32>
    %101 = arith.subf %95, %100 : vector<8x512xf32>
    %102 = arith.mulf %101, %101 : vector<8x512xf32>
    %cst_51 = arith.constant dense<0.000000e+00> : vector<8xf32>
    %103 = vector.multi_reduction <add>, %102, %cst_51 [1] : vector<8x512xf32> to vector<8xf32>
    %104 = vector.shape_cast %103 : vector<8xf32> to vector<8x1xf32>
    %cst_52 = arith.constant 0.001953125 : f32
    %105 = vector.broadcast %cst_52 : f32 to vector<8x1xf32>
    %106 = arith.mulf %104, %105 : vector<8x1xf32>
    %c0_53 = arith.constant 0 : index
    %c0_54 = arith.constant 0 : index
    %107 = vector.load %arg7[%c0_53, %c0_54] : memref<8x1xf32, #tpu.memory_space<vmem>>, vector<8x1xf32>
    %cst_55 = arith.constant 9.99999974E-6 : f32
    %108 = vector.broadcast %cst_55 : f32 to vector<8x1xf32>
    %109 = arith.addf %106, %108 : vector<8x1xf32>
    %110 = math.rsqrt %109 : vector<8x1xf32>
    %111 = arith.mulf %107, %110 : vector<8x1xf32>
    %c0_56 = arith.constant 0 : index
    %c0_57 = arith.constant 0 : index
    %112 = vector.load %arg8[%c0_56, %c0_57] : memref<8x1xf32, #tpu.memory_space<vmem>>, vector<8x1xf32>
    %113 = arith.mulf %99, %111 : vector<8x1xf32>
    %114 = arith.subf %112, %113 : vector<8x1xf32>
    %115 = vector.broadcast %111 : vector<8x1xf32> to vector<8x512xf32>
    %116 = arith.mulf %95, %115 : vector<8x512xf32>
    %117 = vector.broadcast %114 : vector<8x1xf32> to vector<8x512xf32>
    %118 = arith.addf %116, %117 : vector<8x512xf32>
    %cst_58 = arith.constant 0.000000e+00 : f32
    %119 = vector.broadcast %cst_58 : f32 to vector<8x512xf32>
    %120 = arith.maximumf %118, %119 : vector<8x512xf32>
    %c17_i32_59 = arith.constant 17 : i32
    %121 = tpu.dynamic_rotate %120 by %c17_i32_59 dim 1 : vector<8x512xf32>, i32 -> vector<8x512xf32>
    %c0_60 = arith.constant 0 : index
    %c0_61 = arith.constant 0 : index
    %122 = vector.load %arg1[%c0_60, %c0_61] : memref<9x512xf32, #tpu.memory_space<vmem>>, vector<1x512xf32>
    %123 = vector.broadcast %122 : vector<1x512xf32> to vector<8x512xf32>
    %124 = arith.mulf %121, %123 : vector<8x512xf32>
    %c16_i32_62 = arith.constant 16 : i32
    %125 = tpu.dynamic_rotate %120 by %c16_i32_62 dim 1 : vector<8x512xf32>, i32 -> vector<8x512xf32>
    %c1_63 = arith.constant 1 : index
    %c0_64 = arith.constant 0 : index
    %126 = vector.load %arg1[%c1_63, %c0_64] : memref<9x512xf32, #tpu.memory_space<vmem>>, vector<1x512xf32>
    %127 = vector.broadcast %126 : vector<1x512xf32> to vector<8x512xf32>
    %128 = arith.mulf %125, %127 : vector<8x512xf32>
    %c15_i32_65 = arith.constant 15 : i32
    %129 = tpu.dynamic_rotate %120 by %c15_i32_65 dim 1 : vector<8x512xf32>, i32 -> vector<8x512xf32>
    %c2_66 = arith.constant 2 : index
    %c0_67 = arith.constant 0 : index
    %130 = vector.load %arg1[%c2_66, %c0_67] : memref<9x512xf32, #tpu.memory_space<vmem>>, vector<1x512xf32>
    %131 = vector.broadcast %130 : vector<1x512xf32> to vector<8x512xf32>
    %132 = arith.mulf %129, %131 : vector<8x512xf32>
    %c1_i32_68 = arith.constant 1 : i32
    %133 = tpu.dynamic_rotate %120 by %c1_i32_68 dim 1 : vector<8x512xf32>, i32 -> vector<8x512xf32>
    %c3_69 = arith.constant 3 : index
    %c0_70 = arith.constant 0 : index
    %134 = vector.load %arg1[%c3_69, %c0_70] : memref<9x512xf32, #tpu.memory_space<vmem>>, vector<1x512xf32>
    %135 = vector.broadcast %134 : vector<1x512xf32> to vector<8x512xf32>
    %136 = arith.mulf %133, %135 : vector<8x512xf32>
    %c511_i32_71 = arith.constant 511 : i32
    %137 = tpu.dynamic_rotate %120 by %c511_i32_71 dim 1 : vector<8x512xf32>, i32 -> vector<8x512xf32>
    %c5_72 = arith.constant 5 : index
    %c0_73 = arith.constant 0 : index
    %138 = vector.load %arg1[%c5_72, %c0_73] : memref<9x512xf32, #tpu.memory_space<vmem>>, vector<1x512xf32>
    %139 = vector.broadcast %138 : vector<1x512xf32> to vector<8x512xf32>
    %140 = arith.mulf %137, %139 : vector<8x512xf32>
    %c497_i32_74 = arith.constant 497 : i32
    %141 = tpu.dynamic_rotate %120 by %c497_i32_74 dim 1 : vector<8x512xf32>, i32 -> vector<8x512xf32>
    %c6_75 = arith.constant 6 : index
    %c0_76 = arith.constant 0 : index
    %142 = vector.load %arg1[%c6_75, %c0_76] : memref<9x512xf32, #tpu.memory_space<vmem>>, vector<1x512xf32>
    %143 = vector.broadcast %142 : vector<1x512xf32> to vector<8x512xf32>
    %144 = arith.mulf %141, %143 : vector<8x512xf32>
    %c496_i32_77 = arith.constant 496 : i32
    %145 = tpu.dynamic_rotate %120 by %c496_i32_77 dim 1 : vector<8x512xf32>, i32 -> vector<8x512xf32>
    %c7_78 = arith.constant 7 : index
    %c0_79 = arith.constant 0 : index
    %146 = vector.load %arg1[%c7_78, %c0_79] : memref<9x512xf32, #tpu.memory_space<vmem>>, vector<1x512xf32>
    %147 = vector.broadcast %146 : vector<1x512xf32> to vector<8x512xf32>
    %148 = arith.mulf %145, %147 : vector<8x512xf32>
    %c495_i32_80 = arith.constant 495 : i32
    %149 = tpu.dynamic_rotate %120 by %c495_i32_80 dim 1 : vector<8x512xf32>, i32 -> vector<8x512xf32>
    %c8_81 = arith.constant 8 : index
    %c0_82 = arith.constant 0 : index
    %150 = vector.load %arg1[%c8_81, %c0_82] : memref<9x512xf32, #tpu.memory_space<vmem>>, vector<1x512xf32>
    %151 = vector.broadcast %150 : vector<1x512xf32> to vector<8x512xf32>
    %152 = arith.mulf %149, %151 : vector<8x512xf32>
    %153 = tpu.concatenate %124, %128, %132, %136, %120, %140, %144, %148, %152 in 0 : vector<8x512xf32>, vector<8x512xf32>, vector<8x512xf32>, vector<8x512xf32>, vector<8x512xf32>, vector<8x512xf32>, vector<8x512xf32>, vector<8x512xf32>, vector<8x512xf32> -> vector<72x512xf32>
    %c0_83 = arith.constant 0 : index
    %c0_84 = arith.constant 0 : index
    %154 = vector.load %arg9[%c0_83, %c0_84] : memref<8x72xf32, #tpu.memory_space<vmem>>, vector<8x72xf32>
    %cst_85 = arith.constant dense<0.000000e+00> : vector<8x512xf32>
    %155 = tpu.matmul %154, %153, %cst_85 {dimension_numbers = #tpu.dot_dimension_numbers<[1], [0], [0], [1], [0, 0, 1, 1], [], []>} : vector<8x72xf32>, vector<72x512xf32>, vector<8x512xf32> -> vector<8x512xf32>
    %cst_86 = arith.constant dense<0.000000e+00> : vector<8xf32>
    %156 = vector.multi_reduction <add>, %155, %cst_86 [1] : vector<8x512xf32> to vector<8xf32>
    %157 = vector.shape_cast %156 : vector<8xf32> to vector<8x1xf32>
    %cst_87 = arith.constant 0.001953125 : f32
    %158 = vector.broadcast %cst_87 : f32 to vector<8x1xf32>
    %159 = arith.mulf %157, %158 : vector<8x1xf32>
    %160 = vector.broadcast %159 : vector<8x1xf32> to vector<8x512xf32>
    %161 = arith.subf %155, %160 : vector<8x512xf32>
    %162 = arith.mulf %161, %161 : vector<8x512xf32>
    %cst_88 = arith.constant dense<0.000000e+00> : vector<8xf32>
    %163 = vector.multi_reduction <add>, %162, %cst_88 [1] : vector<8x512xf32> to vector<8xf32>
    %164 = vector.shape_cast %163 : vector<8xf32> to vector<8x1xf32>
    %cst_89 = arith.constant 0.001953125 : f32
    %165 = vector.broadcast %cst_89 : f32 to vector<8x1xf32>
    %166 = arith.mulf %164, %165 : vector<8x1xf32>
    %c0_90 = arith.constant 0 : index
    %c0_91 = arith.constant 0 : index
    %167 = vector.load %arg10[%c0_90, %c0_91] : memref<8x1xf32, #tpu.memory_space<vmem>>, vector<8x1xf32>
    %cst_92 = arith.constant 9.99999974E-6 : f32
    %168 = vector.broadcast %cst_92 : f32 to vector<8x1xf32>
    %169 = arith.addf %166, %168 : vector<8x1xf32>
    %170 = math.rsqrt %169 : vector<8x1xf32>
    %171 = arith.mulf %167, %170 : vector<8x1xf32>
    %c0_93 = arith.constant 0 : index
    %c0_94 = arith.constant 0 : index
    %172 = vector.load %arg11[%c0_93, %c0_94] : memref<8x1xf32, #tpu.memory_space<vmem>>, vector<8x1xf32>
    %173 = arith.mulf %159, %171 : vector<8x1xf32>
    %174 = arith.subf %172, %173 : vector<8x1xf32>
    %175 = vector.broadcast %171 : vector<8x1xf32> to vector<8x512xf32>
    %176 = arith.mulf %155, %175 : vector<8x512xf32>
    %177 = vector.broadcast %174 : vector<8x1xf32> to vector<8x512xf32>
    %178 = arith.addf %176, %177 : vector<8x512xf32>
    %cst_95 = arith.constant 0.000000e+00 : f32
    %179 = vector.broadcast %cst_95 : f32 to vector<8x512xf32>
    %180 = arith.maximumf %178, %179 : vector<8x512xf32>
    %c17_i32_96 = arith.constant 17 : i32
    %181 = tpu.dynamic_rotate %180 by %c17_i32_96 dim 1 : vector<8x512xf32>, i32 -> vector<8x512xf32>
    %c0_97 = arith.constant 0 : index
    %c0_98 = arith.constant 0 : index
    %182 = vector.load %arg1[%c0_97, %c0_98] : memref<9x512xf32, #tpu.memory_space<vmem>>, vector<1x512xf32>
    %183 = vector.broadcast %182 : vector<1x512xf32> to vector<8x512xf32>
    %184 = arith.mulf %181, %183 : vector<8x512xf32>
    %c16_i32_99 = arith.constant 16 : i32
    %185 = tpu.dynamic_rotate %180 by %c16_i32_99 dim 1 : vector<8x512xf32>, i32 -> vector<8x512xf32>
    %c1_100 = arith.constant 1 : index
    %c0_101 = arith.constant 0 : index
    %186 = vector.load %arg1[%c1_100, %c0_101] : memref<9x512xf32, #tpu.memory_space<vmem>>, vector<1x512xf32>
    %187 = vector.broadcast %186 : vector<1x512xf32> to vector<8x512xf32>
    %188 = arith.mulf %185, %187 : vector<8x512xf32>
    %c15_i32_102 = arith.constant 15 : i32
    %189 = tpu.dynamic_rotate %180 by %c15_i32_102 dim 1 : vector<8x512xf32>, i32 -> vector<8x512xf32>
    %c2_103 = arith.constant 2 : index
    %c0_104 = arith.constant 0 : index
    %190 = vector.load %arg1[%c2_103, %c0_104] : memref<9x512xf32, #tpu.memory_space<vmem>>, vector<1x512xf32>
    %191 = vector.broadcast %190 : vector<1x512xf32> to vector<8x512xf32>
    %192 = arith.mulf %189, %191 : vector<8x512xf32>
    %c1_i32_105 = arith.constant 1 : i32
    %193 = tpu.dynamic_rotate %180 by %c1_i32_105 dim 1 : vector<8x512xf32>, i32 -> vector<8x512xf32>
    %c3_106 = arith.constant 3 : index
    %c0_107 = arith.constant 0 : index
    %194 = vector.load %arg1[%c3_106, %c0_107] : memref<9x512xf32, #tpu.memory_space<vmem>>, vector<1x512xf32>
    %195 = vector.broadcast %194 : vector<1x512xf32> to vector<8x512xf32>
    %196 = arith.mulf %193, %195 : vector<8x512xf32>
    %c511_i32_108 = arith.constant 511 : i32
    %197 = tpu.dynamic_rotate %180 by %c511_i32_108 dim 1 : vector<8x512xf32>, i32 -> vector<8x512xf32>
    %c5_109 = arith.constant 5 : index
    %c0_110 = arith.constant 0 : index
    %198 = vector.load %arg1[%c5_109, %c0_110] : memref<9x512xf32, #tpu.memory_space<vmem>>, vector<1x512xf32>
    %199 = vector.broadcast %198 : vector<1x512xf32> to vector<8x512xf32>
    %200 = arith.mulf %197, %199 : vector<8x512xf32>
    %c497_i32_111 = arith.constant 497 : i32
    %201 = tpu.dynamic_rotate %180 by %c497_i32_111 dim 1 : vector<8x512xf32>, i32 -> vector<8x512xf32>
    %c6_112 = arith.constant 6 : index
    %c0_113 = arith.constant 0 : index
    %202 = vector.load %arg1[%c6_112, %c0_113] : memref<9x512xf32, #tpu.memory_space<vmem>>, vector<1x512xf32>
    %203 = vector.broadcast %202 : vector<1x512xf32> to vector<8x512xf32>
    %204 = arith.mulf %201, %203 : vector<8x512xf32>
    %c496_i32_114 = arith.constant 496 : i32
    %205 = tpu.dynamic_rotate %180 by %c496_i32_114 dim 1 : vector<8x512xf32>, i32 -> vector<8x512xf32>
    %c7_115 = arith.constant 7 : index
    %c0_116 = arith.constant 0 : index
    %206 = vector.load %arg1[%c7_115, %c0_116] : memref<9x512xf32, #tpu.memory_space<vmem>>, vector<1x512xf32>
    %207 = vector.broadcast %206 : vector<1x512xf32> to vector<8x512xf32>
    %208 = arith.mulf %205, %207 : vector<8x512xf32>
    %c495_i32_117 = arith.constant 495 : i32
    %209 = tpu.dynamic_rotate %180 by %c495_i32_117 dim 1 : vector<8x512xf32>, i32 -> vector<8x512xf32>
    %c8_118 = arith.constant 8 : index
    %c0_119 = arith.constant 0 : index
    %210 = vector.load %arg1[%c8_118, %c0_119] : memref<9x512xf32, #tpu.memory_space<vmem>>, vector<1x512xf32>
    %211 = vector.broadcast %210 : vector<1x512xf32> to vector<8x512xf32>
    %212 = arith.mulf %209, %211 : vector<8x512xf32>
    %213 = tpu.concatenate %184, %188, %192, %196, %180, %200, %204, %208, %212 in 0 : vector<8x512xf32>, vector<8x512xf32>, vector<8x512xf32>, vector<8x512xf32>, vector<8x512xf32>, vector<8x512xf32>, vector<8x512xf32>, vector<8x512xf32>, vector<8x512xf32> -> vector<72x512xf32>
    %c0_120 = arith.constant 0 : index
    %c0_121 = arith.constant 0 : index
    %214 = vector.load %arg12[%c0_120, %c0_121] : memref<8x72xf32, #tpu.memory_space<vmem>>, vector<8x72xf32>
    %cst_122 = arith.constant dense<0.000000e+00> : vector<8x512xf32>
    %215 = tpu.matmul %214, %213, %cst_122 {dimension_numbers = #tpu.dot_dimension_numbers<[1], [0], [0], [1], [0, 0, 1, 1], [], []>} : vector<8x72xf32>, vector<72x512xf32>, vector<8x512xf32> -> vector<8x512xf32>
    %cst_123 = arith.constant dense<0.000000e+00> : vector<8xf32>
    %216 = vector.multi_reduction <add>, %215, %cst_123 [1] : vector<8x512xf32> to vector<8xf32>
    %217 = vector.shape_cast %216 : vector<8xf32> to vector<8x1xf32>
    %cst_124 = arith.constant 0.001953125 : f32
    %218 = vector.broadcast %cst_124 : f32 to vector<8x1xf32>
    %219 = arith.mulf %217, %218 : vector<8x1xf32>
    %220 = vector.broadcast %219 : vector<8x1xf32> to vector<8x512xf32>
    %221 = arith.subf %215, %220 : vector<8x512xf32>
    %222 = arith.mulf %221, %221 : vector<8x512xf32>
    %cst_125 = arith.constant dense<0.000000e+00> : vector<8xf32>
    %223 = vector.multi_reduction <add>, %222, %cst_125 [1] : vector<8x512xf32> to vector<8xf32>
    %224 = vector.shape_cast %223 : vector<8xf32> to vector<8x1xf32>
    %cst_126 = arith.constant 0.001953125 : f32
    %225 = vector.broadcast %cst_126 : f32 to vector<8x1xf32>
    %226 = arith.mulf %224, %225 : vector<8x1xf32>
    %c0_127 = arith.constant 0 : index
    %c0_128 = arith.constant 0 : index
    %227 = vector.load %arg13[%c0_127, %c0_128] : memref<8x1xf32, #tpu.memory_space<vmem>>, vector<8x1xf32>
    %cst_129 = arith.constant 9.99999974E-6 : f32
    %228 = vector.broadcast %cst_129 : f32 to vector<8x1xf32>
    %229 = arith.addf %226, %228 : vector<8x1xf32>
    %230 = math.rsqrt %229 : vector<8x1xf32>
    %231 = arith.mulf %227, %230 : vector<8x1xf32>
    %c0_130 = arith.constant 0 : index
    %c0_131 = arith.constant 0 : index
    %232 = vector.load %arg14[%c0_130, %c0_131] : memref<8x1xf32, #tpu.memory_space<vmem>>, vector<8x1xf32>
    %233 = arith.mulf %219, %231 : vector<8x1xf32>
    %234 = arith.subf %232, %233 : vector<8x1xf32>
    %235 = vector.broadcast %231 : vector<8x1xf32> to vector<8x512xf32>
    %236 = arith.mulf %215, %235 : vector<8x512xf32>
    %237 = vector.broadcast %234 : vector<8x1xf32> to vector<8x512xf32>
    %238 = arith.addf %236, %237 : vector<8x512xf32>
    %cst_132 = arith.constant 0.000000e+00 : f32
    %239 = vector.broadcast %cst_132 : f32 to vector<8x512xf32>
    %240 = arith.maximumf %238, %239 : vector<8x512xf32>
    %c0_133 = arith.constant 0 : index
    %c0_134 = arith.constant 0 : index
    %241 = vector.load %arg15[%c0_133, %c0_134] : memref<8x512xf32, #tpu.memory_space<vmem>>, vector<8x512xf32>
    tpu.vector_store %arg15[%c0_133, %c0_134], %240 {strides = array<i32>} : memref<8x512xf32, #tpu.memory_space<vmem>>, vector<8x512xf32>,
    return
  }
  func.func @transform_0(%arg0: i32) -> (i32, i32) {
    %c0_i32 = arith.constant 0 : i32
    %c0_i32_0 = arith.constant 0 : i32
    %c0_i32_1 = arith.constant 0 : i32
    return %c0_i32, %c0_i32_0 : i32, i32
  }
  func.func @transform_1(%arg0: i32) -> (i32, i32) {
    %c0_i32 = arith.constant 0 : i32
    %c0_i32_0 = arith.constant 0 : i32
    %c0_i32_1 = arith.constant 0 : i32
    return %c0_i32, %c0_i32_0 : i32, i32
  }
  func.func @transform_2(%arg0: i32) -> (i32, i32) {
    %c0_i32 = arith.constant 0 : i32
    %c0_i32_0 = arith.constant 0 : i32
    %c0_i32_1 = arith.constant 0 : i32
    return %c0_i32, %c0_i32_0 : i32, i32
  }
  func.func @transform_3(%arg0: i32) -> (i32, i32) {
    %c0_i32 = arith.constant 0 : i32
    %c0_i32_0 = arith.constant 0 : i32
    %c0_i32_1 = arith.constant 0 : i32
    return %c0_i32, %c0_i32_0 : i32, i32
  }
  func.func @transform_4(%arg0: i32) -> (i32, i32) {
    %c0_i32 = arith.constant 0 : i32
    %c0_i32_0 = arith.constant 0 : i32
    %c0_i32_1 = arith.constant 0 : i32
    return %c0_i32, %c0_i32_0 : i32, i32
  }
  func.func @transform_5(%arg0: i32) -> (i32, i32) {
    %c0_i32 = arith.constant 0 : i32
    %c0_i32_0 = arith.constant 0 : i32
    %c0_i32_1 = arith.constant 0 : i32
    return %c0_i32, %c0_i32_0 : i32, i32
  }
  func.func @transform_6(%arg0: i32) -> (i32, i32) {
    %c0_i32 = arith.constant 0 : i32
    %c0_i32_0 = arith.constant 0 : i32
    %c0_i32_1 = arith.constant 0 : i32
    return %c0_i32, %c0_i32_0 : i32, i32
  }
  func.func @transform_7(%arg0: i32) -> (i32, i32) {
    %c0_i32 = arith.constant 0 : i32
    %c0_i32_0 = arith.constant 0 : i32
    %c0_i32_1 = arith.constant 0 : i32
    return %c0_i32, %c0_i32_0 : i32, i32
  }
  func.func @transform_8(%arg0: i32) -> (i32, i32) {
    %c0_i32 = arith.constant 0 : i32
    %c0_i32_0 = arith.constant 0 : i32
    %c0_i32_1 = arith.constant 0 : i32
    return %c0_i32, %c0_i32_0 : i32, i32
  }
  func.func @transform_9(%arg0: i32) -> (i32, i32) {
    %c0_i32 = arith.constant 0 : i32
    %c0_i32_0 = arith.constant 0 : i32
    %c0_i32_1 = arith.constant 0 : i32
    return %c0_i32, %c0_i32_0 : i32, i32
  }
  func.func @transform_10(%arg0: i32) -> (i32, i32) {
    %c0_i32 = arith.constant 0 : i32
    %c0_i32_0 = arith.constant 0 : i32
    %c0_i32_1 = arith.constant 0 : i32
    return %c0_i32, %c0_i32_0 : i32, i32
  }
  func.func @transform_11(%arg0: i32) -> (i32, i32) {
    %c0_i32 = arith.constant 0 : i32
    %c0_i32_0 = arith.constant 0 : i32
    %c0_i32_1 = arith.constant 0 : i32
    return %c0_i32, %c0_i32_0 : i32, i32
  }
  func.func @transform_12(%arg0: i32) -> (i32, i32) {
    %c0_i32 = arith.constant 0 : i32
    %c0_i32_0 = arith.constant 0 : i32
    %c0_i32_1 = arith.constant 0 : i32
    return %c0_i32, %c0_i32_0 : i32, i32
  }
  func.func @transform_13(%arg0: i32) -> (i32, i32) {
    %c0_i32 = arith.constant 0 : i32
    %c0_i32_0 = arith.constant 0 : i32
    %c0_i32_1 = arith.constant 0 : i32
    return %c0_i32, %c0_i32_0 : i32, i32
  }
  func.func @transform_14(%arg0: i32) -> (i32, i32) {
    %c0_i32 = arith.constant 0 : i32
    %c0_i32_0 = arith.constant 0 : i32
    %c0_i32_1 = arith.constant 0 : i32
    return %c0_i32, %c0_i32_0 : i32, i32
  }
}

</mosaic_0001>

<bundles_post_ra>
// kernel: conv_relu_chain.1
= control target key start
LH: loop header
LB: loop body
LE: loop exit
PB: predicated region body
PF: predicated region fallthrough
CT: control target
= control target key end

     0   :  { %s1708_s15 = smov 16   ;;  %s1709_s16 = smov 17   ;;  %v1715_v4 = vmov 0.0   ;;  %v59_v5 = vlaneseq  ;;  %vm373_vm8 = vcmask 588800   ;;  %s2695_s1 = inlined_call_operand.vmem [shape: f32[8,512], index: 1, kind: input, shape index: {}]   ;;  %s2696_s0 = inlined_call_operand.vmem [shape: f32[9,512], index: 0, kind: input, shape index: {}]   ;;  %s2697_s2 = inlined_call_operand.vmem [shape: f32[8,72], index: 2, kind: input, shape index: {}]   ;;  %s2698_s3 = inlined_call_operand.vmem [shape: f32[8,1], index: 3, kind: input, shape index: {}]   ;;  %s2699_s4 = inlined_call_operand.vmem [shape: f32[8,1], index: 4, kind: input, shape index: {}]   ;;  %s2700_s5 = inlined_call_operand.vmem [shape: f32[8,72], index: 5, kind: input, shape index: {}]   ;;  %s2701_s6 = inlined_call_operand.vmem [shape: f32[8,1], index: 6, kind: input, shape index: {}]   ;;  %s2702_s7 = inlined_call_operand.vmem [shape: f32[8,1], index: 7, kind: input, shape index: {}]   ;;  %s2703_s8 = inlined_call_operand.vmem [shape: f32[8,72], index: 8, kind: input, shape index: {}]   ;;  %s2704_s9 = inlined_call_operand.vmem [shape: f32[8,1], index: 9, kind: input, shape index: {}]   ;;  %s2705_s10 = inlined_call_operand.vmem [shape: f32[8,1], index: 10, kind: input, shape index: {}]   ;;  %s2706_s11 = inlined_call_operand.vmem [shape: f32[8,72], index: 11, kind: input, shape index: {}]   ;;  %s2707_s12 = inlined_call_operand.vmem [shape: f32[8,1], index: 12, kind: input, shape index: {}]   ;;  %s2708_s13 = inlined_call_operand.vmem [shape: f32[8,1], index: 13, kind: input, shape index: {}]   ;;  %s2709_s14 = inlined_call_operand.vmem [shape: f32[8,512], index: 14, kind: output, shape index: {}]  }
   0x1   :  { %v1796_v0 = vld [vmem:[%s2695_s1] sm:$0xff]  ;;  %v1805_v1 = vld [vmem:[%s2695_s1 + $0x8] sm:$0xff]  ;;  %v1814_v2 = vld [vmem:[%s2695_s1 + $0x18] sm:$0xff]  ;;  %s1710_s23 = smov 15   ;;  %s1711_s24 = smov 1   ;;  %441 = vmatprep.mubr.f32.mxu0 %v1715_v4  ;;  %512 = vmatprep.mubr.f32.mxu1 %v1715_v4 }
   0x2   :  { %92 = vrot.lane.b32.xlu1 %v1796_v0, %s1708_s15  ;;  %51 = vrot.lane.b32.xlu0 %v1796_v0, %s1709_s16  ;;  %v1823_v3 = vld [vmem:[%s2695_s1 + $0x10] sm:$0xff]  ;;  %s1712_s1 = smov 127   ;;  %s1713_s25 = smov 113   ;;  %v69_v6 = vshrl.u32 %v59_v5, 7  ;;  %v1879_v7 = vand.u32 127, %v59_v5 }
   0x3   :  { %s1714_s26 = smov 112   ;;  %s1716_s27 = smov 111   ;;  %v66_v9 = vld [vmem:[%s2696_s0] ss:$8 sm:$0xf] }
   0x4   :  { %v1881_v8 = vsub.s32 1, %v69_v6  ;;  %v1545_v10 = vld [vmem:[%s2696_s0 + $0x1] ss:$8 sm:$0xf]  ;;  %vm100_vm0 = vcmp.lt.s32.totalorder %v1879_v7, 16  ;;  %vm61_vm1 = vcmp.lt.s32.totalorder %v1879_v7, 17 }
   0x5   :  { %v1897_v15 = vsub.s32 0, %v69_v6  ;;  %v1903_v20 = vsub.s32 3, %v69_v6  ;;  %v1905_v21 = vsub.s32 2, %v69_v6  ;;  %v1546_v48 = vld [vmem:[%s2696_s0 + $0x2] ss:$8 sm:$0xf] }
   0x6   :  { %94 = vrot.lane.b32.xlu1 %v1805_v1, %s1708_s15  ;;  %53 = vrot.lane.b32.xlu0 %v1805_v1, %s1709_s16  ;;  %v1892_v13 = vrot.slane %v66_v9, %v1881_v8  ;;  %v1895_v14 = vrot.slane %v1545_v10, %v1881_v8  ;;  %v1547_v49 = vld [vmem:[%s2696_s0 + $0x3] ss:$8 sm:$0xf]  ;;  %vm140_vm2 = vcmp.lt.s32.totalorder %v1879_v7, 15  ;;  %v1953_v54 = vrot.slane %v1546_v48, %v1881_v8 }
   0x7   :  { %v1910_v24 = vrot.slane %v66_v9, %v1897_v15  ;;  %v1913_v25 = vrot.slane %v1545_v10, %v1897_v15  ;;  %v1920_v31 = vrot.slane %v66_v9, %v1903_v20  ;;  %v1923_v32 = vrot.slane %v1545_v10, %v1903_v20 }
   0x8   :  { %v1928_v35 = vrot.slane %v66_v9, %v1905_v21  ;;  %v1931_v36 = vrot.slane %v1545_v10, %v1905_v21  ;;  %vm180_vm3 = vcmp.lt.s32.totalorder %v1879_v7, 1  ;;  %v1957_v55 = vrot.slane %v1547_v49, %v1881_v8 }
   0x9   :  { %v1966_v62 = vrot.slane %v1547_v49, %v1897_v15  ;;  %v1969_v63 = vrot.slane %v1546_v48, %v1897_v15  ;;  %vm220_vm4 = vcmp.lt.s32.totalorder %v1879_v7, 127  ;;  %vm260_vm5 = vcmp.lt.s32.totalorder %v1879_v7, 113 }
   0xa   :  { %98 = vrot.lane.b32.xlu1 %v1814_v2, %s1708_s15  ;;  %57 = vrot.lane.b32.xlu0 %v1814_v2, %s1709_s16  ;;  %vm300_vm6 = vcmp.lt.s32.totalorder %v1879_v7, 112  ;;  %vm340_vm7 = vcmp.lt.s32.totalorder %v1879_v7, 111 }
   0xe   :  { %96 = vrot.lane.b32.xlu1 %v1823_v3, %s1708_s15  ;;  %55 = vrot.lane.b32.xlu0 %v1823_v3, %s1709_s16 }
  0x12   :  { %134 = vrot.lane.b32.xlu1 %v1805_v1, %s1710_s23  ;;  %132 = vrot.lane.b32.xlu0 %v1796_v0, %s1710_s23 }
  0x16   :  { %174 = vrot.lane.b32.xlu1 %v1805_v1, %s1711_s24  ;;  %172 = vrot.lane.b32.xlu0 %v1796_v0, %s1711_s24 }
  0x1a   :  { %178 = vrot.lane.b32.xlu1 %v1814_v2, %s1711_s24  ;;  %138 = vrot.lane.b32.xlu0 %v1814_v2, %s1710_s23 }
  0x1e   :  { %176 = vrot.lane.b32.xlu1 %v1823_v3, %s1711_s24  ;;  %136 = vrot.lane.b32.xlu0 %v1823_v3, %s1710_s23 }
  0x22   :  { %216 = vrot.lane.b32.xlu1 %v1823_v3, %s1712_s1  ;;  %214 = vrot.lane.b32.xlu0 %v1805_v1, %s1712_s1 }
  0x26   :  { %218 = vrot.lane.b32.xlu1 %v1814_v2, %s1712_s1  ;;  %212 = vrot.lane.b32.xlu0 %v1796_v0, %s1712_s1 }
  0x2a   :  { %256 = vrot.lane.b32.xlu1 %v1823_v3, %s1713_s25  ;;  %254 = vrot.lane.b32.xlu0 %v1805_v1, %s1713_s25 }
  0x2e   :  { %296 = vrot.lane.b32.xlu1 %v1823_v3, %s1714_s26  ;;  %294 = vrot.lane.b32.xlu0 %v1805_v1, %s1714_s26 }
  0x32   :  { %292 = vrot.lane.b32.xlu1 %v1796_v0, %s1714_s26  ;;  %252 = vrot.lane.b32.xlu0 %v1796_v0, %s1713_s25 }
  0x36   :  { %298 = vrot.lane.b32.xlu1 %v1814_v2, %s1714_s26  ;;  %258 = vrot.lane.b32.xlu0 %v1814_v2, %s1713_s25 }
  0x3a   :  { %336 = vrot.lane.b32.xlu1 %v1823_v3, %s1716_s27  ;;  %334 = vrot.lane.b32.xlu0 %v1805_v1, %s1716_s27 }
  0x3e   :  { %338 = vrot.lane.b32.xlu1 %v1814_v2, %s1716_s27  ;;  %332 = vrot.lane.b32.xlu0 %v1796_v0, %s1716_s27 }
  0x74   :  { %v93_v11 = vpop.permute.xlu1 %92  ;;  %v52_v12 = vpop.permute.xlu0 %51 }
  0x78   :  { %v95_v16 = vpop.permute.xlu1 %94  ;;  %v54_v17 = vpop.permute.xlu0 %53 }
  0x79   :  { %v64_v18 = vsel %vm61_vm1, %v52_v12, %v54_v17  ;;  %v103_v19 = vsel %vm100_vm0, %v93_v11, %v95_v16 }
  0x7a   :  { %v89_v22 = vmul.f32 %v1892_v13, %v64_v18  ;;  %v129_v23 = vmul.f32 %v1895_v14, %v103_v19 }
  0x7c   :  { %v99_v26 = vpop.permute.xlu1 %98  ;;  %v58_v27 = vpop.permute.xlu0 %57  ;;  %v1560_v28 = vpack.c.bf16 %v129_v23, %v89_v22  ;;  %v1987_v22 = vrot.slane %v1546_v48, %v1905_v21  ;;  %v1990_v23 = vrot.slane %v1546_v48, %v1903_v20 }
  0x7d   :  { %v104_v29 = vsel %vm100_vm0, %v99_v26, %v93_v11  ;;  %v65_v30 = vsel %vm61_vm1, %v58_v27, %v52_v12  ;;  %v1976_v12 = vrot.slane %v1547_v49, %v1905_v21 }
  0x7e   :  { %1561 = vmatprep.subr.bf16.mxu0 %v1560_v28  ;;  %v88_v33 = vmul.f32 %v1910_v24, %v65_v30  ;;  %v128_v34 = vmul.f32 %v1913_v25, %v104_v29 }
  0x80   :  { %v97_v37 = vpop.permute.xlu1 %96  ;;  %v56_v38 = vpop.permute.xlu0 %55  ;;  %v1562_v39 = vpack.c.bf16 %v128_v34, %v88_v33 }
  0x81   :  { %v102_v40 = vsel %vm100_vm0, %v95_v16, %v97_v37  ;;  %v63_v41 = vsel %vm61_vm1, %v54_v17, %v56_v38  ;;  %v62_v42 = vsel %vm61_vm1, %v56_v38, %v58_v27  ;;  %v101_v43 = vsel %vm100_vm0, %v97_v37, %v99_v26  ;;  %v1548_v17 = vld [vmem:[%s2696_s0 + $0x5] ss:$8 sm:$0xf] }
  0x82   :  { %1563 = vmatpush1.bf16.msra.mxu0 %v1562_v39  ;;  %v91_v44 = vmul.f32 %v1920_v31, %v62_v42  ;;  %v131_v45 = vmul.f32 %v1923_v32, %v101_v43  ;;  %v90_v46 = vmul.f32 %v1928_v35, %v63_v41  ;;  %v130_v47 = vmul.f32 %v1931_v36, %v102_v40 }
  0x83   :  { %v1979_v16 = vrot.slane %v1547_v49, %v1903_v20  ;;  %v1994_v29 = vrot.slane %v1548_v17, %v1881_v8  ;;  %v2012_v48 = vrot.slane %v1548_v17, %v1905_v21  ;;  %v2015_v49 = vrot.slane %v1548_v17, %v1897_v15 }
  0x84   :  { %v135_v50 = vpop.permute.xlu1 %134  ;;  %v133_v51 = vpop.permute.xlu0 %132  ;;  %v1576_v52 = vpack.c.bf16 %v131_v45, %v91_v44  ;;  %v1578_v53 = vpack.c.bf16 %v130_v47, %v90_v46 }
  0x85   :  { %v143_v56 = vsel %vm140_vm2, %v133_v51, %v135_v50 }
  0x86   :  { %1577 = vmatprep.subr.bf16.mxu1 %v1576_v52  ;;  %v169_v60 = vmul.f32 %v1953_v54, %v143_v56 }
  0x87   :  { %1579 = vmatpush1.bf16.msra.mxu1 %v1578_v53 }
  0x88   :  { %v175_v57 = vpop.permute.xlu1 %174  ;;  %v173_v58 = vpop.permute.xlu0 %172 }
  0x89   :  { %v183_v59 = vsel %vm180_vm3, %v173_v58, %v175_v57 }
  0x8a   :  { %v209_v61 = vmul.f32 %v1957_v55, %v183_v59 }
  0x8c   :  { %v179_v5 = vpop.permute.xlu1 %178  ;;  %v139_v6 = vpop.permute.xlu0 %138  ;;  %v1564_v9 = vpack.c.bf16 %v209_v61, %v169_v60 }
  0x8d   :  { %v184_v10 = vsel %vm180_vm3, %v179_v5, %v173_v58  ;;  %v144_v11 = vsel %vm140_vm2, %v139_v6, %v133_v51 }
  0x8e   :  { %v208_v18 = vmul.f32 %v1966_v62, %v184_v10  ;;  %v168_v19 = vmul.f32 %v1969_v63, %v144_v11  ;;  %1565 = vmatprep.subr.bf16.mxu0 %v1564_v9 }
  0x90   :  { %v177_v26 = vpop.permute.xlu1 %176  ;;  %v137_v27 = vpop.permute.xlu0 %136  ;;  %v1566_v28 = vpack.c.bf16 %v208_v18, %v168_v19 }
  0x91   :  { %v181_v30 = vsel %vm180_vm3, %v177_v26, %v179_v5  ;;  %v182_v33 = vsel %vm180_vm3, %v175_v57, %v177_v26  ;;  %v141_v34 = vsel %vm140_vm2, %v137_v27, %v139_v6  ;;  %v142_v37 = vsel %vm140_vm2, %v135_v50, %v137_v27  ;;  %v1550_v5 = vld [vmem:[%s2696_s0 + $0x7] ss:$8 sm:$0xf] }
  0x92   :  { %v210_v38 = vmul.f32 %v1976_v12, %v182_v33  ;;  %v211_v39 = vmul.f32 %v1979_v16, %v181_v30  ;;  %v170_v40 = vmul.f32 %v1987_v22, %v142_v37  ;;  %v171_v41 = vmul.f32 %v1990_v23, %v141_v34  ;;  %1567 = vmatpush1.bf16.msra.mxu0 %v1566_v28 }
  0x93   :  { %v2018_v50 = vrot.slane %v1548_v17, %v1903_v20  ;;  %v2045_v19 = vrot.slane %v1550_v5, %v1881_v8  ;;  %v2054_v30 = vrot.slane %v1550_v5, %v1897_v15 }
  0x94   :  { %v217_v42 = vpop.permute.xlu1 %216  ;;  %v215_v43 = vpop.permute.xlu0 %214  ;;  %v1580_v44 = vpack.c.bf16 %v211_v39, %v171_v41  ;;  %v1582_v45 = vpack.c.bf16 %v210_v38, %v170_v40  ;;  %v2064_v41 = vrot.slane %v1550_v5, %v1905_v21 }
  0x95   :  { %v222_v46 = vsel %vm220_vm4, %v215_v43, %v217_v42 }
  0x96   :  { %v249_v47 = vmul.f32 %v1994_v29, %v222_v46  ;;  %1581 = vmatprep.subr.bf16.mxu1 %v1580_v44 }
  0x97   :  { %1583 = vmatpush1.bf16.msra.mxu1 %v1582_v45 }
  0x98   :  { %v219_v51 = vpop.permute.xlu1 %218  ;;  %v213_v52 = vpop.permute.xlu0 %212  ;;  %v1568_v53 = vpack.c.bf16 %v249_v47, %v1805_v1  ;;  %v1549_v1 = vld [vmem:[%s2696_s0 + $0x6] ss:$8 sm:$0xf] }
  0x99   :  { %v221_v56 = vsel %vm220_vm4, %v217_v42, %v219_v51  ;;  %v223_v57 = vsel %vm220_vm4, %v213_v52, %v215_v43  ;;  %v224_v58 = vsel %vm220_vm4, %v219_v51, %v213_v52  ;;  %v2041_v18 = vrot.slane %v1549_v1, %v1881_v8  ;;  %v1551_v43 = vld [vmem:[%s2696_s0 + $0x20] ss:$8 sm:$0xf] }
  0x9a   :  { %v250_v59 = vmul.f32 %v2012_v48, %v221_v56  ;;  %v248_v60 = vmul.f32 %v2015_v49, %v223_v57  ;;  %v251_v61 = vmul.f32 %v2018_v50, %v224_v58  ;;  %1569 = vmatprep.subr.bf16.mxu0 %v1568_v53  ;;  %v2057_v33 = vrot.slane %v1549_v1, %v1897_v15 }
  0x9b   :  { %v2067_v42 = vrot.slane %v1550_v5, %v1903_v20  ;;  %v2075_v46 = vrot.slane %v1549_v1, %v1905_v21  ;;  %v2078_v47 = vrot.slane %v1549_v1, %v1903_v20  ;;  %v2082_v56 = vrot.slane %v1551_v43, %v1881_v8 }
  0x9c   :  { %v257_v6 = vpop.permute.xlu1 %256  ;;  %v255_v9 = vpop.permute.xlu0 %254  ;;  %v1570_v10 = vpack.c.bf16 %v248_v60, %v1796_v0  ;;  %v1584_v11 = vpack.c.bf16 %v251_v61, %v1814_v2  ;;  %v1586_v17 = vpack.c.bf16 %v250_v59, %v1823_v3 }
  0x9d   :  { %v262_v26 = vsel %vm260_vm5, %v255_v9, %v257_v6 }
  0x9e   :  { %1571 = vmatpush1.bf16.msra.mxu0 %v1570_v10  ;;  %1585 = vmatprep.subr.bf16.mxu1 %v1584_v11  ;;  %v289_v3 = vmul.f32 %v2041_v18, %v262_v26 }
  0x9f   :  { %1587 = vmatpush1.bf16.msra.mxu1 %v1586_v17 }
  0xa0   :  { %v297_v27 = vpop.permute.xlu1 %296  ;;  %v295_v0 = vpop.permute.xlu0 %294 }
  0xa1   :  { %v302_v2 = vsel %vm300_vm6, %v295_v0, %v297_v27 }
  0xa2   :  { %v329_v28 = vmul.f32 %v2045_v19, %v302_v2  ;;  %v2106_v2 = vrot.slane %v1551_v43, %v1905_v21  ;;  %v372_v21 = vld [vmem:[%s2697_s2] sm:$0xff] }
  0xa4   :  { %v293_v34 = vpop.permute.xlu1 %292  ;;  %v253_v37 = vpop.permute.xlu0 %252  ;;  %v1572_v38 = vpack.c.bf16 %v329_v28, %v289_v3 }
  0xa5   :  { %v303_v39 = vsel %vm300_vm6, %v293_v34, %v295_v0  ;;  %v263_v40 = vsel %vm260_vm5, %v253_v37, %v255_v9  ;;  %v2103_v0 = vrot.slane %v1551_v43, %v1903_v20 }
  0xa6   :  { %v328_v44 = vmul.f32 %v2054_v30, %v303_v39  ;;  %v288_v45 = vmul.f32 %v2057_v33, %v263_v40  ;;  %1573 = vmatprep.subr.bf16.mxu0 %v1572_v38 }
  0xa8   :  { %v299_v51 = vpop.permute.xlu1 %298  ;;  %v259_v52 = vpop.permute.xlu0 %258  ;;  %v1574_v53 = vpack.c.bf16 %v328_v44, %v288_v45 }
  0xa9   :  { %v301_v57 = vsel %vm300_vm6, %v297_v27, %v299_v51  ;;  %v304_v58 = vsel %vm300_vm6, %v299_v51, %v293_v34  ;;  %v261_v59 = vsel %vm260_vm5, %v257_v6, %v259_v52  ;;  %v264_v60 = vsel %vm260_vm5, %v259_v52, %v253_v37 }
  0xaa   :  { %v330_v61 = vmul.f32 %v2064_v41, %v301_v57  ;;  %v331_v1 = vmul.f32 %v2067_v42, %v304_v58  ;;  %v290_v5 = vmul.f32 %v2075_v46, %v261_v59  ;;  %v291_v8 = vmul.f32 %v2078_v47, %v264_v60  ;;  %1575 = vmatpush1.bf16.msra.mxu0 %v1574_v53 }
  0xab   :  { %v2100_v27 = vrot.slane %v1551_v43, %v1897_v15 }
  0xac   :  { %v337_v9 = vpop.permute.xlu1 %336  ;;  %v335_v10 = vpop.permute.xlu0 %334  ;;  %v1588_v11 = vpack.c.bf16 %v331_v1, %v291_v8  ;;  %v1590_v17 = vpack.c.bf16 %v330_v61, %v290_v5 }
  0xad   :  { %v342_v26 = vsel %vm340_vm7, %v335_v10, %v337_v9 }
  0xae   :  { %1589 = vmatprep.subr.bf16.mxu1 %v1588_v11  ;;  %v369_v6 = vmul.f32 %v2082_v56, %v342_v26 }
  0xaf   :  { %1591 = vmatpush1.bf16.msra.mxu1 %v1590_v17 }
  0xb0   :  { %v339_v3 = vpop.permute.xlu1 %338  ;;  %v333_v28 = vpop.permute.xlu0 %332  ;;  %393 = vmatprep.subr.mxu0 %v369_v6  ;;  %v1717_v6 = vmov 0  }
  0xb1   :  { %v341_v34 = vsel %vm340_vm7, %v337_v9, %v339_v3  ;;  %v343_v37 = vsel %vm340_vm7, %v333_v28, %v335_v10  ;;  %v344_v15 = vsel %vm340_vm7, %v339_v3, %v333_v28  ;;  %1698 = vset.pattern.permute.xlu0 %v1717_v6  ;;  %1699 = vset.pattern.permute.xlu1 %v1717_v6 }
  0xb2   :  { %v368_v38 = vmul.f32 %v2100_v27, %v343_v37  ;;  %v371_v20 = vmul.f32 %v2103_v0, %v344_v15  ;;  %v370_v39 = vmul.f32 %v2106_v2, %v341_v34  ;;  %v539_v37 = vld [vmem:[%s2698_s3] sm:$0xff] }
  0xb4   :  { %394 = vmatpush1.msra.mxu0 %v368_v38  ;;  %464 = vmatprep.subr.mxu1 %v371_v20  ;;  %v543_v20 = vld [vmem:[%s2699_s4] sm:$0xff] }
  0xb5   :  { %1552 = vmatmul.mubr.msk.f32.vlgmr.msra.gmra.mrb[0].mxu0 %vm373_vm8, %v372_v21  ;;  %465 = vmatpush1.msra.mxu1 %v370_v39 }
  0xb6   :  { %1553 = vmatmul.mubr.msk.f32.vlgmr.msra.gmra.mrb[0].mxu1 %vm373_vm8, %v372_v21  ;;  %764 = vmatprep.mubr.f32.mxu0 %v1715_v4 }
  0xb7   :  { %835 = vmatprep.mubr.f32.mxu1 %v1715_v4 }
 0x188   :  { %v443_v40 = vpop.f32.mrb[0].mxu0 }
 0x189   :  { %v445_v43 = vpop.f32.mrb[1].mxu0  ;;  %v514_v44 = vpop.f32.mrb[0].mxu1 }
 0x18a   :  { %v519_v45 = vadd.f32 %v445_v43, %v443_v40  ;;  %v516_v51 = vpop.f32.mrb[1].mxu1 }
 0x18c   :  { %v520_v52 = vadd.f32 %v519_v45, %v514_v44 }
 0x18e   :  { %v521_v53 = vadd.f32 %v520_v52, %v516_v51 }
 0x190   :  { %522 = vadd.xlane.f32.xlu0 %v521_v53 }
 0x21d   :  { %v523_v57 = vpop.xlane.xlu0 %522 }
 0x21e   :  { %v524_v58 = vmul.f32 0.001953125, %v523_v57 }
 0x220   :  { %v525_v59 = vsub.f32 %v443_v40, %v524_v58  ;;  %v526_v60 = vsub.f32 %v445_v43, %v524_v58  ;;  %v527_v61 = vsub.f32 %v514_v44, %v524_v58  ;;  %v528_v1 = vsub.f32 %v516_v51, %v524_v58 }
 0x222   :  { %v529_v5 = vmul.f32 %v525_v59, %v525_v59  ;;  %v530_v8 = vmul.f32 %v526_v60, %v526_v60  ;;  %v531_v9 = vmul.f32 %v527_v61, %v527_v61  ;;  %v532_v11 = vmul.f32 %v528_v1, %v528_v1 }
 0x224   :  { %v533_v10 = vadd.f32 %v530_v8, %v529_v5 }
 0x226   :  { %v534_v17 = vadd.f32 %v533_v10, %v531_v9 }
 0x228   :  { %v535_v26 = vadd.f32 %v534_v17, %v532_v11 }
 0x22a   :  { %536 = vadd.xlane.f32.xlu1 %v535_v26 }
 0x2b7   :  { %v537_v3 = vpop.xlane.xlu1 %536 }
 0x2b8   :  { %v538_v28 = vmul.f32 0.001953125, %v537_v3 }
 0x2ba   :  { %v540_v34 = vadd.f32 1e-05, %v538_v28 }
 0x2bc   :  { %1700 = vrsqrt.f32 %v540_v34 }
 0x2c6   :  { %v1701_v15 = vpop.eup %1700 }
 0x2c7   :  { %v542_v38 = vmul.f32 %v1701_v15, %v539_v37 }
 0x2c9   :  { %548 = vperm.xlu0 %1698, %v542_v38   ;;  %v544_v21 = vmul.f32 %v542_v38, %v524_v58 }
 0x2cb   :  { %v545_v39 = vsub.f32 %v543_v20, %v544_v21 }
 0x2cd   :  { %557 = vperm.xlu1 %1699, %v545_v39  }
 0x348   :  { %v549_v45 = vpop.permute.xlu0 %548 }
 0x349   :  { %v551_v52 = vmul.f32 %v549_v45, %v443_v40  ;;  %v553_v53 = vmul.f32 %v549_v45, %v514_v44  ;;  %v552_v59 = vmul.f32 %v549_v45, %v445_v43  ;;  %v554_v9 = vmul.f32 %v549_v45, %v516_v51 }
 0x34c   :  { %v558_v57 = vpop.permute.xlu1 %557 }
 0x34d   :  { %v560_v60 = vadd.f32 %v558_v57, %v551_v52  ;;  %v562_v61 = vadd.f32 %v558_v57, %v553_v53  ;;  %v561_v1 = vadd.f32 %v558_v57, %v552_v59  ;;  %v563_v40 = vadd.f32 %v558_v57, %v554_v9 }
 0x34f   :  { %v2130_v5 = vmax.f32 %v560_v60, 0.0  ;;  %v2132_v8 = vmax.f32 %v562_v61, 0.0  ;;  %v2138_v58 = vmax.f32 %v561_v1, 0.0  ;;  %v2148_v43 = vmax.f32 %v563_v40, 0.0 }
 0x351   :  { %572 = vrot.lane.b32.xlu0 %v2132_v8, %s1709_s16  ;;  %568 = vrot.lane.b32.xlu1 %v2130_v5, %s1709_s16 }
 0x355   :  { %600 = vrot.lane.b32.xlu0 %v2130_v5, %s1710_s23  ;;  %570 = vrot.lane.b32.xlu1 %v2138_v58, %s1709_s16 }
 0x359   :  { %616 = vrot.lane.b32.xlu0 %v2130_v5, %s1711_s24  ;;  %584 = vrot.lane.b32.xlu1 %v2130_v5, %s1708_s15 }
 0x35d   :  { %606 = vrot.lane.b32.xlu0 %v2148_v43, %s1710_s23  ;;  %586 = vrot.lane.b32.xlu1 %v2138_v58, %s1708_s15 }
 0x361   :  { %604 = vrot.lane.b32.xlu0 %v2132_v8, %s1710_s23  ;;  %574 = vrot.lane.b32.xlu1 %v2148_v43, %s1709_s16 }
 0x365   :  { %634 = vrot.lane.b32.xlu0 %v2138_v58, %s1712_s1  ;;  %590 = vrot.lane.b32.xlu1 %v2148_v43, %s1708_s15 }
 0x369   :  { %632 = vrot.lane.b32.xlu0 %v2130_v5, %s1712_s1  ;;  %588 = vrot.lane.b32.xlu1 %v2132_v8, %s1708_s15 }
 0x36d   :  { %650 = vrot.lane.b32.xlu0 %v2138_v58, %s1713_s25  ;;  %602 = vrot.lane.b32.xlu1 %v2138_v58, %s1710_s23 }
 0x371   :  { %666 = vrot.lane.b32.xlu0 %v2138_v58, %s1714_s26  ;;  %618 = vrot.lane.b32.xlu1 %v2138_v58, %s1711_s24 }
 0x375   :  { %648 = vrot.lane.b32.xlu0 %v2130_v5, %s1713_s25  ;;  %622 = vrot.lane.b32.xlu1 %v2148_v43, %s1711_s24 }
 0x379   :  { %654 = vrot.lane.b32.xlu0 %v2148_v43, %s1713_s25  ;;  %620 = vrot.lane.b32.xlu1 %v2132_v8, %s1711_s24 }
 0x37d   :  { %682 = vrot.lane.b32.xlu0 %v2138_v58, %s1716_s27  ;;  %636 = vrot.lane.b32.xlu1 %v2132_v8, %s1712_s1 }
 0x381   :  { %680 = vrot.lane.b32.xlu0 %v2130_v5, %s1716_s27  ;;  %638 = vrot.lane.b32.xlu1 %v2148_v43, %s1712_s1 }
 0x385   :  { %652 = vrot.lane.b32.xlu1 %v2132_v8, %s1713_s25 }
 0x389   :  { %668 = vrot.lane.b32.xlu1 %v2132_v8, %s1714_s26 }
 0x38d   :  { %664 = vrot.lane.b32.xlu1 %v2130_v5, %s1714_s26 }
 0x391   :  { %670 = vrot.lane.b32.xlu1 %v2148_v43, %s1714_s26 }
 0x395   :  { %684 = vrot.lane.b32.xlu1 %v2132_v8, %s1716_s27 }
 0x399   :  { %686 = vrot.lane.b32.xlu1 %v2148_v43, %s1716_s27 }
 0x3c3   :  { %v573_v44 = vpop.permute.xlu0 %572  ;;  %v569_v51 = vpop.permute.xlu1 %568 }
 0x3c7   :  { %v601_v10 = vpop.permute.xlu0 %600  ;;  %v571_v11 = vpop.permute.xlu1 %570 }
 0x3c8   :  { %v578_v6 = vsel %vm61_vm1, %v569_v51, %v571_v11  ;;  %v577_v59 = vsel %vm61_vm1, %v571_v11, %v573_v44 }
 0x3c9   :  { %v581_v37 = vmul.f32 %v578_v6, %v1892_v13 }
 0x3cb   :  { %v617_v17 = vpop.permute.xlu0 %616  ;;  %v585_v26 = vpop.permute.xlu1 %584 }
 0x3cf   :  { %v607_v3 = vpop.permute.xlu0 %606  ;;  %v587_v28 = vpop.permute.xlu1 %586 }
 0x3d0   :  { %v594_v34 = vsel %vm100_vm0, %v585_v26, %v587_v28 }
 0x3d1   :  { %v597_v15 = vmul.f32 %v594_v34, %v1895_v14 }
 0x3d3   :  { %v575_v38 = vpop.permute.xlu1 %574  ;;  %v1592_v20 = vpack.c.bf16 %v597_v15, %v581_v37  ;;  %v605_v21 = vpop.permute.xlu0 %604 }
 0x3d4   :  { %v579_v39 = vsel %vm61_vm1, %v575_v38, %v569_v51  ;;  %v576_v60 = vsel %vm61_vm1, %v573_v44, %v575_v38 }
 0x3d5   :  { %1593 = vmatprep.subr.bf16.mxu0 %v1592_v20  ;;  %v580_v53 = vmul.f32 %v579_v39, %v1910_v24  ;;  %v583_v6 = vmul.f32 %v576_v60, %v1920_v31 }
 0x3d7   :  { %v591_v45 = vpop.permute.xlu1 %590  ;;  %v635_v61 = vpop.permute.xlu0 %634 }
 0x3d8   :  { %v595_v52 = vsel %vm100_vm0, %v591_v45, %v585_v26  ;;  %v582_v26 = vmul.f32 %v577_v59, %v1928_v35 }
 0x3d9   :  { %v596_v57 = vmul.f32 %v595_v52, %v1913_v25 }
 0x3db   :  { %v1594_v1 = vpack.c.bf16 %v596_v57, %v580_v53  ;;  %v589_v9 = vpop.permute.xlu1 %588  ;;  %v633_v38 = vpop.permute.xlu0 %632  ;;  %v611_v53 = vsel %vm140_vm2, %v607_v3, %v601_v10 }
 0x3dc   :  { %v592_v40 = vsel %vm100_vm0, %v589_v9, %v591_v45  ;;  %v593_v51 = vsel %vm100_vm0, %v587_v28, %v589_v9  ;;  %v612_v9 = vmul.f32 %v611_v53, %v1969_v63 }
 0x3dd   :  { %v598_v34 = vmul.f32 %v593_v51, %v1931_v36  ;;  %v599_v11 = vmul.f32 %v592_v40, %v1923_v32  ;;  %1595 = vmatpush1.bf16.msra.mxu0 %v1594_v1  ;;  %v608_v40 = vsel %vm140_vm2, %v605_v21, %v607_v3  ;;  %v642_v3 = vsel %vm220_vm4, %v633_v38, %v635_v61 }
 0x3df   :  { %v1610_v37 = vpack.c.bf16 %v598_v34, %v582_v26  ;;  %v603_v44 = vpop.permute.xlu1 %602  ;;  %v1608_v15 = vpack.c.bf16 %v599_v11, %v583_v6  ;;  %v651_v57 = vpop.permute.xlu0 %650 }
 0x3e0   :  { %v610_v20 = vsel %vm140_vm2, %v601_v10, %v603_v44  ;;  %v609_v26 = vsel %vm140_vm2, %v603_v44, %v605_v21  ;;  %v615_v10 = vmul.f32 %v608_v40, %v1990_v23 }
 0x3e1   :  { %1609 = vmatprep.subr.bf16.mxu1 %v1608_v15  ;;  %v613_v45 = vmul.f32 %v610_v20, %v1953_v54  ;;  %v614_v15 = vmul.f32 %v609_v26, %v1987_v22 }
 0x3e2   :  { %1611 = vmatpush1.bf16.msra.mxu1 %v1610_v37 }
 0x3e3   :  { %v619_v39 = vpop.permute.xlu1 %618  ;;  %v667_v11 = vpop.permute.xlu0 %666 }
 0x3e4   :  { %v626_v28 = vsel %vm180_vm3, %v617_v17, %v619_v39 }
 0x3e5   :  { %v629_v52 = vmul.f32 %v626_v28, %v1957_v55 }
 0x3e7   :  { %v623_v59 = vpop.permute.xlu1 %622  ;;  %v1596_v60 = vpack.c.bf16 %v629_v52, %v613_v45  ;;  %v644_v52 = vmul.f32 %v642_v3, %v2015_v49 }
 0x3e8   :  { %v627_v1 = vsel %vm180_vm3, %v623_v59, %v617_v17 }
 0x3e9   :  { %v628_v51 = vmul.f32 %v627_v1, %v1966_v62  ;;  %1597 = vmatprep.subr.bf16.mxu0 %v1596_v60 }
 0x3eb   :  { %v1598_v6 = vpack.c.bf16 %v628_v51, %v612_v9  ;;  %v621_v34 = vpop.permute.xlu1 %620  ;;  %v1602_v9 = vpack.c.bf16 %v644_v52, %v2130_v5 }
 0x3ec   :  { %v624_v37 = vsel %vm180_vm3, %v621_v34, %v623_v59  ;;  %v625_v17 = vsel %vm180_vm3, %v619_v39, %v621_v34  ;;  %v649_v59 = vpop.permute.xlu0 %648 }
 0x3ed   :  { %v630_v20 = vmul.f32 %v625_v17, %v1976_v12  ;;  %v631_v21 = vmul.f32 %v624_v37, %v1979_v16  ;;  %1599 = vmatpush1.bf16.msra.mxu0 %v1598_v6 }
 0x3ef   :  { %v1614_v44 = vpack.c.bf16 %v630_v20, %v614_v15  ;;  %v637_v28 = vpop.permute.xlu1 %636  ;;  %v1612_v45 = vpack.c.bf16 %v631_v21, %v615_v10 }
 0x3f0   :  { %v641_v53 = vsel %vm220_vm4, %v635_v61, %v637_v28 }
 0x3f1   :  { %v645_v39 = vmul.f32 %v641_v53, %v1994_v29  ;;  %1613 = vmatprep.subr.bf16.mxu1 %v1612_v45 }
 0x3f2   :  { %1615 = vmatpush1.bf16.msra.mxu1 %v1614_v44 }
 0x3f3   :  { %v639_v60 = vpop.permute.xlu1 %638  ;;  %v1600_v1 = vpack.c.bf16 %v645_v39, %v2138_v58  ;;  %v655_v58 = vpop.permute.xlu0 %654 }
 0x3f4   :  { %v640_v40 = vsel %vm220_vm4, %v637_v28, %v639_v60  ;;  %v643_v51 = vsel %vm220_vm4, %v639_v60, %v633_v38  ;;  %v659_v45 = vsel %vm260_vm5, %v655_v58, %v649_v59 }
 0x3f5   :  { %v646_v26 = vmul.f32 %v640_v40, %v2012_v48  ;;  %v647_v61 = vmul.f32 %v643_v51, %v2018_v50  ;;  %1601 = vmatprep.subr.bf16.mxu0 %v1600_v1  ;;  %v663_v1 = vmul.f32 %v659_v45, %v2078_v47 }
 0x3f6   :  { %1603 = vmatpush1.bf16.msra.mxu0 %v1602_v9 }
 0x3f7   :  { %v1618_v6 = vpack.c.bf16 %v646_v26, %v2132_v8  ;;  %v653_v34 = vpop.permute.xlu1 %652  ;;  %v1616_v10 = vpack.c.bf16 %v647_v61, %v2148_v43  ;;  %v658_v8 = vsel %vm260_vm5, %v649_v59, %v651_v57  ;;  %v683_v15 = vpop.permute.xlu0 %682 }
 0x3f8   :  { %v657_v5 = vsel %vm260_vm5, %v651_v57, %v653_v34  ;;  %v660_v44 = vmul.f32 %v658_v8, %v2057_v33  ;;  %v656_v52 = vsel %vm260_vm5, %v653_v34, %v655_v58 }
 0x3f9   :  { %1617 = vmatprep.subr.bf16.mxu1 %v1616_v10  ;;  %v661_v17 = vmul.f32 %v657_v5, %v2041_v18  ;;  %v662_v9 = vmul.f32 %v656_v52, %v2075_v46  ;;  %v696_v5 = vld [vmem:[%s2700_s5] sm:$0xff] }
 0x3fa   :  { %1619 = vmatpush1.bf16.msra.mxu1 %v1618_v6 }
 0x3fb   :  { %v669_v37 = vpop.permute.xlu1 %668  ;;  %v681_v57 = vpop.permute.xlu0 %680 }
 0x3fc   :  { %v673_v38 = vsel %vm300_vm6, %v667_v11, %v669_v37  ;;  %v690_v51 = vsel %vm340_vm7, %v681_v57, %v683_v15 }
 0x3fd   :  { %v677_v3 = vmul.f32 %v673_v38, %v2045_v19  ;;  %v692_v58 = vmul.f32 %v690_v51, %v2100_v27 }
 0x3ff   :  { %v665_v20 = vpop.permute.xlu1 %664  ;;  %v1604_v43 = vpack.c.bf16 %v677_v3, %v661_v17 }
 0x400   :  { %v674_v21 = vsel %vm300_vm6, %v665_v20, %v667_v11 }
 0x401   :  { %v676_v28 = vmul.f32 %v674_v21, %v2054_v30  ;;  %1605 = vmatprep.subr.bf16.mxu0 %v1604_v43 }
 0x403   :  { %v1606_v53 = vpack.c.bf16 %v676_v28, %v660_v44  ;;  %v671_v39 = vpop.permute.xlu1 %670 }
 0x404   :  { %v672_v60 = vsel %vm300_vm6, %v669_v37, %v671_v39  ;;  %v675_v11 = vsel %vm300_vm6, %v671_v39, %v665_v20 }
 0x405   :  { %v678_v40 = vmul.f32 %v672_v60, %v2064_v41  ;;  %v679_v59 = vmul.f32 %v675_v11, %v2067_v42  ;;  %1607 = vmatpush1.bf16.msra.mxu0 %v1606_v53 }
 0x407   :  { %v1622_v26 = vpack.c.bf16 %v678_v40, %v662_v9  ;;  %v685_v61 = vpop.permute.xlu1 %684  ;;  %v1620_v6 = vpack.c.bf16 %v679_v59, %v663_v1 }
 0x408   :  { %v689_v34 = vsel %vm340_vm7, %v683_v15, %v685_v61 }
 0x409   :  { %v693_v10 = vmul.f32 %v689_v34, %v2082_v56  ;;  %1621 = vmatprep.subr.bf16.mxu1 %v1620_v6 }
 0x40a   :  { %1623 = vmatpush1.bf16.msra.mxu1 %v1622_v26 }
 0x40b   :  { %716 = vmatprep.subr.mxu0 %v693_v10  ;;  %v687_v37 = vpop.permute.xlu1 %686 }
 0x40c   :  { %v688_v38 = vsel %vm340_vm7, %v685_v61, %v687_v37  ;;  %v691_v17 = vsel %vm340_vm7, %v687_v37, %v681_v57  ;;  %717 = vmatpush1.msra.mxu0 %v692_v58  ;;  %v862_v58 = vld [vmem:[%s2701_s6] sm:$0xff] }
 0x40d   :  { %v694_v3 = vmul.f32 %v688_v38, %v2106_v2  ;;  %v695_v8 = vmul.f32 %v691_v17, %v2103_v0  ;;  %1554 = vmatmul.mubr.msk.f32.vlgmr.msra.gmra.mrb[2].mxu0 %vm373_vm8, %v696_v5  ;;  %v866_v38 = vld [vmem:[%s2702_s7] sm:$0xff] }
 0x40e   :  { %1087 = vmatprep.mubr.f32.mxu0 %v1715_v4 }
 0x40f   :  { %787 = vmatprep.subr.mxu1 %v695_v8 }
 0x410   :  { %788 = vmatpush1.msra.mxu1 %v694_v3 }
 0x411   :  { %1555 = vmatmul.mubr.msk.f32.vlgmr.msra.gmra.mrb[2].mxu1 %vm373_vm8, %v696_v5 }
 0x412   :  { %1158 = vmatprep.mubr.f32.mxu1 %v1715_v4 }
 0x4e0   :  { %v766_v15 = vpop.f32.mrb[2].mxu0 }
 0x4e1   :  { %v768_v20 = vpop.f32.mrb[3].mxu0 }
 0x4e2   :  { %v842_v43 = vadd.f32 %v768_v20, %v766_v15 }
 0x4e4   :  { %v837_v21 = vpop.f32.mrb[2].mxu1 }
 0x4e5   :  { %v839_v44 = vpop.f32.mrb[3].mxu1  ;;  %v843_v28 = vadd.f32 %v842_v43, %v837_v21 }
 0x4e7   :  { %v844_v45 = vadd.f32 %v843_v28, %v839_v44 }
 0x4e9   :  { %845 = vadd.xlane.f32.xlu0 %v844_v45 }
 0x576   :  { %v846_v52 = vpop.xlane.xlu0 %845 }
 0x577   :  { %v847_v53 = vmul.f32 0.001953125, %v846_v52 }
 0x579   :  { %v848_v39 = vsub.f32 %v766_v15, %v847_v53  ;;  %v849_v57 = vsub.f32 %v768_v20, %v847_v53  ;;  %v850_v60 = vsub.f32 %v837_v21, %v847_v53  ;;  %v851_v11 = vsub.f32 %v839_v44, %v847_v53 }
 0x57b   :  { %v852_v1 = vmul.f32 %v848_v39, %v848_v39  ;;  %v853_v9 = vmul.f32 %v849_v57, %v849_v57  ;;  %v854_v40 = vmul.f32 %v850_v60, %v850_v60  ;;  %v855_v51 = vmul.f32 %v851_v11, %v851_v11 }
 0x57d   :  { %v856_v59 = vadd.f32 %v853_v9, %v852_v1 }
 0x57f   :  { %v857_v26 = vadd.f32 %v856_v59, %v854_v40 }
 0x581   :  { %v858_v61 = vadd.f32 %v857_v26, %v855_v51 }
 0x583   :  { %859 = vadd.xlane.f32.xlu1 %v858_v61 }
 0x610   :  { %v860_v6 = vpop.xlane.xlu1 %859 }
 0x611   :  { %v861_v34 = vmul.f32 0.001953125, %v860_v6 }
 0x613   :  { %v863_v10 = vadd.f32 1e-05, %v861_v34 }
 0x615   :  { %1702 = vrsqrt.f32 %v863_v10 }
 0x61f   :  { %v1703_v5 = vpop.eup %1702 }
 0x620   :  { %v865_v37 = vmul.f32 %v1703_v5, %v862_v58 }
 0x622   :  { %871 = vperm.xlu0 %1698, %v865_v37   ;;  %v867_v17 = vmul.f32 %v865_v37, %v847_v53 }
 0x624   :  { %v868_v3 = vsub.f32 %v866_v38, %v867_v17 }
 0x626   :  { %880 = vperm.xlu1 %1699, %v868_v3  }
 0x6a1   :  { %v872_v8 = vpop.permute.xlu0 %871 }
 0x6a2   :  { %v874_v43 = vmul.f32 %v872_v8, %v766_v15  ;;  %v875_v28 = vmul.f32 %v872_v8, %v768_v20  ;;  %v877_v11 = vmul.f32 %v872_v8, %v839_v44  ;;  %v876_v1 = vmul.f32 %v872_v8, %v837_v21 }
 0x6a5   :  { %v881_v45 = vpop.permute.xlu1 %880 }
 0x6a6   :  { %v883_v52 = vadd.f32 %v881_v45, %v874_v43  ;;  %v884_v39 = vadd.f32 %v881_v45, %v875_v28  ;;  %v886_v53 = vadd.f32 %v881_v45, %v877_v11  ;;  %v885_v15 = vadd.f32 %v881_v45, %v876_v1 }
 0x6a8   :  { %v2315_v57 = vmax.f32 %v883_v52, 0.0  ;;  %v2317_v60 = vmax.f32 %v884_v39, 0.0  ;;  %v2327_v20 = vmax.f32 %v886_v53, 0.0  ;;  %v2333_v44 = vmax.f32 %v885_v15, 0.0 }
 0x6aa   :  { %893 = vrot.lane.b32.xlu1 %v2317_v60, %s1709_s16  ;;  %891 = vrot.lane.b32.xlu0 %v2315_v57, %s1709_s16 }
 0x6ae   :  { %909 = vrot.lane.b32.xlu1 %v2317_v60, %s1708_s15  ;;  %907 = vrot.lane.b32.xlu0 %v2315_v57, %s1708_s15 }
 0x6b2   :  { %913 = vrot.lane.b32.xlu1 %v2327_v20, %s1708_s15  ;;  %897 = vrot.lane.b32.xlu0 %v2327_v20, %s1709_s16 }
 0x6b6   :  { %911 = vrot.lane.b32.xlu1 %v2333_v44, %s1708_s15  ;;  %895 = vrot.lane.b32.xlu0 %v2333_v44, %s1709_s16 }
 0x6ba   :  { %925 = vrot.lane.b32.xlu1 %v2317_v60, %s1710_s23  ;;  %923 = vrot.lane.b32.xlu0 %v2315_v57, %s1710_s23 }
 0x6be   :  { %941 = vrot.lane.b32.xlu1 %v2317_v60, %s1711_s24  ;;  %939 = vrot.lane.b32.xlu0 %v2315_v57, %s1711_s24 }
 0x6c2   :  { %945 = vrot.lane.b32.xlu1 %v2327_v20, %s1711_s24  ;;  %929 = vrot.lane.b32.xlu0 %v2327_v20, %s1710_s23 }
 0x6c6   :  { %943 = vrot.lane.b32.xlu1 %v2333_v44, %s1711_s24  ;;  %927 = vrot.lane.b32.xlu0 %v2333_v44, %s1710_s23 }
 0x6ca   :  { %959 = vrot.lane.b32.xlu1 %v2333_v44, %s1712_s1  ;;  %957 = vrot.lane.b32.xlu0 %v2317_v60, %s1712_s1 }
 0x6ce   :  { %961 = vrot.lane.b32.xlu1 %v2327_v20, %s1712_s1  ;;  %955 = vrot.lane.b32.xlu0 %v2315_v57, %s1712_s1 }
 0x6d2   :  { %975 = vrot.lane.b32.xlu1 %v2333_v44, %s1713_s25  ;;  %973 = vrot.lane.b32.xlu0 %v2317_v60, %s1713_s25 }
 0x6d6   :  { %991 = vrot.lane.b32.xlu1 %v2333_v44, %s1714_s26  ;;  %989 = vrot.lane.b32.xlu0 %v2317_v60, %s1714_s26 }
 0x6da   :  { %987 = vrot.lane.b32.xlu1 %v2315_v57, %s1714_s26  ;;  %971 = vrot.lane.b32.xlu0 %v2315_v57, %s1713_s25 }
 0x6de   :  { %993 = vrot.lane.b32.xlu1 %v2327_v20, %s1714_s26  ;;  %977 = vrot.lane.b32.xlu0 %v2327_v20, %s1713_s25 }
 0x6e2   :  { %1007 = vrot.lane.b32.xlu1 %v2333_v44, %s1716_s27  ;;  %1005 = vrot.lane.b32.xlu0 %v2317_v60, %s1716_s27 }
 0x6e6   :  { %1009 = vrot.lane.b32.xlu1 %v2327_v20, %s1716_s27  ;;  %1003 = vrot.lane.b32.xlu0 %v2315_v57, %s1716_s27 }
 0x71c   :  { %v894_v21 = vpop.permute.xlu1 %893  ;;  %v892_v9 = vpop.permute.xlu0 %891 }
 0x71d   :  { %v901_v40 = vsel %vm61_vm1, %v892_v9, %v894_v21 }
 0x71e   :  { %v904_v61 = vmul.f32 %v901_v40, %v1892_v13 }
 0x720   :  { %v910_v59 = vpop.permute.xlu1 %909  ;;  %v908_v51 = vpop.permute.xlu0 %907 }
 0x721   :  { %v917_v26 = vsel %vm100_vm0, %v908_v51, %v910_v59 }
 0x722   :  { %v920_v6 = vmul.f32 %v917_v26, %v1895_v14 }
 0x724   :  { %v914_v34 = vpop.permute.xlu1 %913  ;;  %v898_v10 = vpop.permute.xlu0 %897  ;;  %v1624_v58 = vpack.c.bf16 %v920_v6, %v904_v61 }
 0x725   :  { %v918_v5 = vsel %vm100_vm0, %v914_v34, %v908_v51  ;;  %v902_v37 = vsel %vm61_vm1, %v898_v10, %v892_v9 }
 0x726   :  { %v919_v38 = vmul.f32 %v918_v5, %v1913_v25  ;;  %v903_v17 = vmul.f32 %v902_v37, %v1910_v24  ;;  %1625 = vmatprep.subr.bf16.mxu0 %v1624_v58 }
 0x728   :  { %v1626_v3 = vpack.c.bf16 %v919_v38, %v903_v17  ;;  %v912_v8 = vpop.permute.xlu1 %911  ;;  %v896_v43 = vpop.permute.xlu0 %895 }
 0x729   :  { %v915_v28 = vsel %vm100_vm0, %v912_v8, %v914_v34  ;;  %v916_v45 = vsel %vm100_vm0, %v910_v59, %v912_v8  ;;  %v899_v52 = vsel %vm61_vm1, %v896_v43, %v898_v10  ;;  %v900_v39 = vsel %vm61_vm1, %v894_v21, %v896_v43 }
 0x72a   :  { %v921_v11 = vmul.f32 %v916_v45, %v1931_v36  ;;  %v922_v53 = vmul.f32 %v915_v28, %v1923_v32  ;;  %v905_v1 = vmul.f32 %v900_v39, %v1928_v35  ;;  %v906_v15 = vmul.f32 %v899_v52, %v1920_v31  ;;  %1627 = vmatpush1.bf16.msra.mxu0 %v1626_v3 }
 0x72c   :  { %v1642_v9 = vpack.c.bf16 %v921_v11, %v905_v1  ;;  %v926_v40 = vpop.permute.xlu1 %925  ;;  %v924_v51 = vpop.permute.xlu0 %923  ;;  %v1640_v26 = vpack.c.bf16 %v922_v53, %v906_v15 }
 0x72d   :  { %v933_v59 = vsel %vm140_vm2, %v924_v51, %v926_v40 }
 0x72e   :  { %1641 = vmatprep.subr.bf16.mxu1 %v1640_v26  ;;  %v936_v34 = vmul.f32 %v933_v59, %v1953_v54 }
 0x72f   :  { %1643 = vmatpush1.bf16.msra.mxu1 %v1642_v9 }
 0x730   :  { %v942_v61 = vpop.permute.xlu1 %941  ;;  %v940_v21 = vpop.permute.xlu0 %939 }
 0x731   :  { %v949_v6 = vsel %vm180_vm3, %v940_v21, %v942_v61 }
 0x732   :  { %v952_v10 = vmul.f32 %v949_v6, %v1957_v55 }
 0x734   :  { %v946_v58 = vpop.permute.xlu1 %945  ;;  %v930_v5 = vpop.permute.xlu0 %929  ;;  %v1628_v37 = vpack.c.bf16 %v952_v10, %v936_v34 }
 0x735   :  { %v950_v38 = vsel %vm180_vm3, %v946_v58, %v940_v21  ;;  %v934_v17 = vsel %vm140_vm2, %v930_v5, %v924_v51 }
 0x736   :  { %v951_v3 = vmul.f32 %v950_v38, %v1966_v62  ;;  %v935_v8 = vmul.f32 %v934_v17, %v1969_v63  ;;  %1629 = vmatprep.subr.bf16.mxu0 %v1628_v37 }
 0x738   :  { %v1630_v43 = vpack.c.bf16 %v951_v3, %v935_v8  ;;  %v944_v28 = vpop.permute.xlu1 %943  ;;  %v928_v45 = vpop.permute.xlu0 %927 }
 0x739   :  { %v947_v52 = vsel %vm180_vm3, %v944_v28, %v946_v58  ;;  %v948_v39 = vsel %vm180_vm3, %v942_v61, %v944_v28  ;;  %v931_v11 = vsel %vm140_vm2, %v928_v45, %v930_v5  ;;  %v932_v53 = vsel %vm140_vm2, %v926_v40, %v928_v45 }
 0x73a   :  { %v953_v1 = vmul.f32 %v948_v39, %v1976_v12  ;;  %v954_v15 = vmul.f32 %v947_v52, %v1979_v16  ;;  %v937_v9 = vmul.f32 %v932_v53, %v1987_v22  ;;  %v938_v51 = vmul.f32 %v931_v11, %v1990_v23  ;;  %1631 = vmatpush1.bf16.msra.mxu0 %v1630_v43 }
 0x73c   :  { %v1646_v26 = vpack.c.bf16 %v953_v1, %v937_v9  ;;  %v960_v59 = vpop.permute.xlu1 %959  ;;  %v958_v21 = vpop.permute.xlu0 %957  ;;  %v1644_v6 = vpack.c.bf16 %v954_v15, %v938_v51 }
 0x73d   :  { %v964_v61 = vsel %vm220_vm4, %v958_v21, %v960_v59 }
 0x73e   :  { %v968_v34 = vmul.f32 %v964_v61, %v1994_v29  ;;  %1645 = vmatprep.subr.bf16.mxu1 %v1644_v6 }
 0x73f   :  { %1647 = vmatpush1.bf16.msra.mxu1 %v1646_v26 }
 0x740   :  { %v962_v40 = vpop.permute.xlu1 %961  ;;  %v956_v10 = vpop.permute.xlu0 %955  ;;  %v1632_v58 = vpack.c.bf16 %v968_v34, %v2317_v60 }
 0x741   :  { %v963_v5 = vsel %vm220_vm4, %v960_v59, %v962_v40  ;;  %v965_v37 = vsel %vm220_vm4, %v956_v10, %v958_v21  ;;  %v966_v38 = vsel %vm220_vm4, %v962_v40, %v956_v10 }
 0x742   :  { %v969_v17 = vmul.f32 %v963_v5, %v2012_v48  ;;  %v967_v3 = vmul.f32 %v965_v37, %v2015_v49  ;;  %v970_v8 = vmul.f32 %v966_v38, %v2018_v50  ;;  %1633 = vmatprep.subr.bf16.mxu0 %v1632_v58 }
 0x744   :  { %v1650_v43 = vpack.c.bf16 %v969_v17, %v2333_v44  ;;  %v1634_v60 = vpack.c.bf16 %v967_v3, %v2315_v57  ;;  %v976_v28 = vpop.permute.xlu1 %975  ;;  %v974_v45 = vpop.permute.xlu0 %973  ;;  %v1648_v52 = vpack.c.bf16 %v970_v8, %v2327_v20 }
 0x745   :  { %v980_v39 = vsel %vm260_vm5, %v974_v45, %v976_v28 }
 0x746   :  { %1635 = vmatpush1.bf16.msra.mxu0 %v1634_v60  ;;  %1649 = vmatprep.subr.bf16.mxu1 %v1648_v52  ;;  %v984_v15 = vmul.f32 %v980_v39, %v2041_v18 }
 0x747   :  { %1651 = vmatpush1.bf16.msra.mxu1 %v1650_v43 }
 0x748   :  { %v992_v11 = vpop.permute.xlu1 %991  ;;  %v990_v53 = vpop.permute.xlu0 %989 }
 0x749   :  { %v996_v1 = vsel %vm300_vm6, %v990_v53, %v992_v11 }
 0x74a   :  { %v1000_v44 = vmul.f32 %v996_v1, %v2045_v19 }
 0x74c   :  { %v988_v57 = vpop.permute.xlu1 %987  ;;  %v972_v9 = vpop.permute.xlu0 %971  ;;  %v1636_v51 = vpack.c.bf16 %v1000_v44, %v984_v15 }
 0x74d   :  { %v997_v20 = vsel %vm300_vm6, %v988_v57, %v990_v53  ;;  %v981_v26 = vsel %vm260_vm5, %v972_v9, %v974_v45 }
 0x74e   :  { %v999_v59 = vmul.f32 %v997_v20, %v2054_v30  ;;  %v983_v21 = vmul.f32 %v981_v26, %v2057_v33  ;;  %1637 = vmatprep.subr.bf16.mxu0 %v1636_v51  ;;  %v1019_v51 = vld [vmem:[%s2703_s8] sm:$0xff] }
 0x750   :  { %v1638_v6 = vpack.c.bf16 %v999_v59, %v983_v21  ;;  %v994_v61 = vpop.permute.xlu1 %993  ;;  %v978_v34 = vpop.permute.xlu0 %977 }
 0x751   :  { %v995_v40 = vsel %vm300_vm6, %v992_v11, %v994_v61  ;;  %v998_v10 = vsel %vm300_vm6, %v994_v61, %v988_v57  ;;  %v979_v58 = vsel %vm260_vm5, %v976_v28, %v978_v34  ;;  %v982_v5 = vsel %vm260_vm5, %v978_v34, %v972_v9 }
 0x752   :  { %v1001_v37 = vmul.f32 %v995_v40, %v2064_v41  ;;  %v1002_v38 = vmul.f32 %v998_v10, %v2067_v42  ;;  %v985_v17 = vmul.f32 %v979_v58, %v2075_v46  ;;  %v986_v3 = vmul.f32 %v982_v5, %v2078_v47  ;;  %1639 = vmatpush1.bf16.msra.mxu0 %v1638_v6 }
 0x754   :  { %v1654_v8 = vpack.c.bf16 %v1001_v37, %v985_v17  ;;  %v1008_v43 = vpop.permute.xlu1 %1007  ;;  %v1006_v60 = vpop.permute.xlu0 %1005  ;;  %v1652_v45 = vpack.c.bf16 %v1002_v38, %v986_v3 }
 0x755   :  { %v1012_v52 = vsel %vm340_vm7, %v1006_v60, %v1008_v43 }
 0x756   :  { %v1016_v28 = vmul.f32 %v1012_v52, %v2082_v56  ;;  %1653 = vmatprep.subr.bf16.mxu1 %v1652_v45 }
 0x757   :  { %1655 = vmatpush1.bf16.msra.mxu1 %v1654_v8 }
 0x758   :  { %v1010_v39 = vpop.permute.xlu1 %1009  ;;  %1039 = vmatprep.subr.mxu0 %v1016_v28  ;;  %v1004_v11 = vpop.permute.xlu0 %1003 }
 0x759   :  { %v1011_v53 = vsel %vm340_vm7, %v1008_v43, %v1010_v39  ;;  %v1013_v1 = vsel %vm340_vm7, %v1004_v11, %v1006_v60  ;;  %v1014_v15 = vsel %vm340_vm7, %v1010_v39, %v1004_v11  ;;  %v1185_v11 = vld [vmem:[%s2704_s9] sm:$0xff] }
 0x75a   :  { %v1017_v44 = vmul.f32 %v1011_v53, %v2106_v2  ;;  %v1015_v57 = vmul.f32 %v1013_v1, %v2100_v27  ;;  %v1018_v9 = vmul.f32 %v1014_v15, %v2103_v0  ;;  %v1189_v15 = vld [vmem:[%s2705_s10] sm:$0xff] }
 0x75c   :  { %1040 = vmatpush1.msra.mxu0 %v1015_v57  ;;  %1110 = vmatprep.subr.mxu1 %v1018_v9 }
 0x75d   :  { %1556 = vmatmul.mubr.msk.f32.vlgmr.msra.gmra.mrb[4].mxu0 %vm373_vm8, %v1019_v51  ;;  %1111 = vmatpush1.msra.mxu1 %v1017_v44 }
 0x75e   :  { %1557 = vmatmul.mubr.msk.f32.vlgmr.msra.gmra.mrb[4].mxu1 %vm373_vm8, %v1019_v51  ;;  %1410 = vmatprep.mubr.f32.mxu0 %v1715_v4 }
 0x75f   :  { %1481 = vmatprep.mubr.f32.mxu1 %v1715_v4 }
 0x830   :  { %v1089_v20 = vpop.f32.mrb[4].mxu0 }
 0x831   :  { %v1091_v26 = vpop.f32.mrb[5].mxu0  ;;  %v1160_v59 = vpop.f32.mrb[4].mxu1 }
 0x832   :  { %v1165_v21 = vadd.f32 %v1091_v26, %v1089_v20  ;;  %v1162_v6 = vpop.f32.mrb[5].mxu1 }
 0x834   :  { %v1166_v61 = vadd.f32 %v1165_v21, %v1160_v59 }
 0x836   :  { %v1167_v34 = vadd.f32 %v1166_v61, %v1162_v6 }
 0x838   :  { %1168 = vadd.xlane.f32.xlu0 %v1167_v34 }
 0x8c5   :  { %v1169_v40 = vpop.xlane.xlu0 %1168 }
 0x8c6   :  { %v1170_v10 = vmul.f32 0.001953125, %v1169_v40 }
 0x8c8   :  { %v1171_v58 = vsub.f32 %v1089_v20, %v1170_v10  ;;  %v1172_v5 = vsub.f32 %v1091_v26, %v1170_v10  ;;  %v1173_v37 = vsub.f32 %v1160_v59, %v1170_v10  ;;  %v1174_v38 = vsub.f32 %v1162_v6, %v1170_v10 }
 0x8ca   :  { %v1175_v17 = vmul.f32 %v1171_v58, %v1171_v58  ;;  %v1176_v3 = vmul.f32 %v1172_v5, %v1172_v5  ;;  %v1177_v8 = vmul.f32 %v1173_v37, %v1173_v37  ;;  %v1178_v60 = vmul.f32 %v1174_v38, %v1174_v38 }
 0x8cc   :  { %v1179_v43 = vadd.f32 %v1176_v3, %v1175_v17 }
 0x8ce   :  { %v1180_v4 = vadd.f32 %v1179_v43, %v1177_v8 }
 0x8d0   :  { %v1181_v45 = vadd.f32 %v1180_v4, %v1178_v60 }
 0x8d2   :  { %1182 = vadd.xlane.f32.xlu1 %v1181_v45 }
 0x95f   :  { %v1183_v52 = vpop.xlane.xlu1 %1182 }
 0x960   :  { %v1184_v28 = vmul.f32 0.001953125, %v1183_v52 }
 0x962   :  { %v1186_v39 = vadd.f32 1e-05, %v1184_v28 }
 0x964   :  { %1704 = vrsqrt.f32 %v1186_v39 }
 0x96e   :  { %v1705_v53 = vpop.eup %1704 }
 0x96f   :  { %v1188_v1 = vmul.f32 %v1705_v53, %v1185_v11 }
 0x971   :  { %1194 = vperm.xlu0 %1698, %v1188_v1   ;;  %v1190_v44 = vmul.f32 %v1188_v1, %v1170_v10 }
 0x973   :  { %v1191_v57 = vsub.f32 %v1189_v15, %v1190_v44 }
 0x975   :  { %1203 = vperm.xlu1 %1699, %v1191_v57  }
 0x9f0   :  { %v1195_v9 = vpop.permute.xlu0 %1194 }
 0x9f1   :  { %v1197_v51 = vmul.f32 %v1195_v9, %v1089_v20  ;;  %v1198_v21 = vmul.f32 %v1195_v9, %v1091_v26  ;;  %v1200_v37 = vmul.f32 %v1195_v9, %v1162_v6  ;;  %v1199_v38 = vmul.f32 %v1195_v9, %v1160_v59 }
 0x9f4   :  { %v1204_v61 = vpop.permute.xlu1 %1203 }
 0x9f5   :  { %v1206_v34 = vadd.f32 %v1204_v61, %v1197_v51  ;;  %v1207_v40 = vadd.f32 %v1204_v61, %v1198_v21  ;;  %v1209_v10 = vadd.f32 %v1204_v61, %v1200_v37  ;;  %v1208_v20 = vadd.f32 %v1204_v61, %v1199_v38 }
 0x9f7   :  { %v2500_v58 = vmax.f32 %v1206_v34, 0.0  ;;  %v2502_v5 = vmax.f32 %v1207_v40, 0.0  ;;  %v2512_v26 = vmax.f32 %v1209_v10, 0.0  ;;  %v2518_v6 = vmax.f32 %v1208_v20, 0.0 }
 0x9f9   :  { %1216 = vrot.lane.b32.xlu1 %v2502_v5, %s1709_s16  ;;  %1214 = vrot.lane.b32.xlu0 %v2500_v58, %s1709_s16 }
 0x9fd   :  { %1232 = vrot.lane.b32.xlu1 %v2502_v5, %s1708_s15  ;;  %1230 = vrot.lane.b32.xlu0 %v2500_v58, %s1708_s15 }
 0xa01   :  { %1236 = vrot.lane.b32.xlu1 %v2512_v26, %s1708_s15  ;;  %1220 = vrot.lane.b32.xlu0 %v2512_v26, %s1709_s16 }
 0xa05   :  { %1234 = vrot.lane.b32.xlu1 %v2518_v6, %s1708_s15  ;;  %1218 = vrot.lane.b32.xlu0 %v2518_v6, %s1709_s16 }
 0xa09   :  { %1248 = vrot.lane.b32.xlu1 %v2502_v5, %s1710_s23  ;;  %1246 = vrot.lane.b32.xlu0 %v2500_v58, %s1710_s23 }
 0xa0d   :  { %1264 = vrot.lane.b32.xlu1 %v2502_v5, %s1711_s24  ;;  %1262 = vrot.lane.b32.xlu0 %v2500_v58, %s1711_s24 }
 0xa11   :  { %1268 = vrot.lane.b32.xlu1 %v2512_v26, %s1711_s24  ;;  %1252 = vrot.lane.b32.xlu0 %v2512_v26, %s1710_s23 }
 0xa15   :  { %1266 = vrot.lane.b32.xlu1 %v2518_v6, %s1711_s24  ;;  %1250 = vrot.lane.b32.xlu0 %v2518_v6, %s1710_s23 }
 0xa19   :  { %1282 = vrot.lane.b32.xlu1 %v2518_v6, %s1712_s1  ;;  %1280 = vrot.lane.b32.xlu0 %v2502_v5, %s1712_s1 }
 0xa1d   :  { %1284 = vrot.lane.b32.xlu1 %v2512_v26, %s1712_s1  ;;  %1278 = vrot.lane.b32.xlu0 %v2500_v58, %s1712_s1 }
 0xa21   :  { %1298 = vrot.lane.b32.xlu1 %v2518_v6, %s1713_s25  ;;  %1296 = vrot.lane.b32.xlu0 %v2502_v5, %s1713_s25 }
 0xa25   :  { %1314 = vrot.lane.b32.xlu1 %v2518_v6, %s1714_s26  ;;  %1312 = vrot.lane.b32.xlu0 %v2502_v5, %s1714_s26 }
 0xa29   :  { %1310 = vrot.lane.b32.xlu1 %v2500_v58, %s1714_s26  ;;  %1294 = vrot.lane.b32.xlu0 %v2500_v58, %s1713_s25 }
 0xa2d   :  { %1316 = vrot.lane.b32.xlu1 %v2512_v26, %s1714_s26  ;;  %1300 = vrot.lane.b32.xlu0 %v2512_v26, %s1713_s25 }
 0xa31   :  { %1330 = vrot.lane.b32.xlu1 %v2518_v6, %s1716_s27  ;;  %1328 = vrot.lane.b32.xlu0 %v2502_v5, %s1716_s27 }
 0xa35   :  { %1332 = vrot.lane.b32.xlu1 %v2512_v26, %s1716_s27  ;;  %1326 = vrot.lane.b32.xlu0 %v2500_v58, %s1716_s27 }
 0xa6b   :  { %v1217_v59 = vpop.permute.xlu1 %1216  ;;  %v1215_v17 = vpop.permute.xlu0 %1214 }
 0xa6c   :  { %v1224_v3 = vsel %vm61_vm1, %v1215_v17, %v1217_v59 }
 0xa6d   :  { %v1227_v4 = vmul.f32 %v1224_v3, %v1892_v13 }
 0xa6f   :  { %v1233_v8 = vpop.permute.xlu1 %1232  ;;  %v1231_v43 = vpop.permute.xlu0 %1230 }
 0xa70   :  { %v1240_v60 = vsel %vm100_vm0, %v1231_v43, %v1233_v8 }
 0xa71   :  { %v1243_v45 = vmul.f32 %v1240_v60, %v1895_v14 }
 0xa73   :  { %v1237_v52 = vpop.permute.xlu1 %1236  ;;  %v1221_v28 = vpop.permute.xlu0 %1220  ;;  %v1656_v39 = vpack.c.bf16 %v1243_v45, %v1227_v4 }
 0xa74   :  { %v1241_v11 = vsel %vm100_vm0, %v1237_v52, %v1231_v43  ;;  %v1225_v53 = vsel %vm61_vm1, %v1221_v28, %v1215_v17 }
 0xa75   :  { %v1242_v1 = vmul.f32 %v1241_v11, %v1913_v25  ;;  %v1226_v15 = vmul.f32 %v1225_v53, %v1910_v24  ;;  %1657 = vmatprep.subr.bf16.mxu0 %v1656_v39 }
 0xa77   :  { %v1658_v44 = vpack.c.bf16 %v1242_v1, %v1226_v15  ;;  %v1235_v57 = vpop.permute.xlu1 %1234  ;;  %v1219_v9 = vpop.permute.xlu0 %1218 }
 0xa78   :  { %v1238_v13 = vsel %vm100_vm0, %v1235_v57, %v1237_v52  ;;  %v1239_v14 = vsel %vm100_vm0, %v1233_v8, %v1235_v57  ;;  %v1222_v51 = vsel %vm61_vm1, %v1219_v9, %v1221_v28  ;;  %v1223_v21 = vsel %vm61_vm1, %v1217_v59, %v1219_v9 }
 0xa79   :  { %v1244_v25 = vmul.f32 %v1239_v14, %v1931_v36  ;;  %v1245_v24 = vmul.f32 %v1238_v13, %v1923_v32  ;;  %v1228_v61 = vmul.f32 %v1223_v21, %v1928_v35  ;;  %v1229_v34 = vmul.f32 %v1222_v51, %v1920_v31  ;;  %1659 = vmatpush1.bf16.msra.mxu0 %v1658_v44 }
 0xa7b   :  { %v1674_v40 = vpack.c.bf16 %v1244_v25, %v1228_v61  ;;  %v1249_v37 = vpop.permute.xlu1 %1248  ;;  %v1247_v10 = vpop.permute.xlu0 %1246  ;;  %v1672_v38 = vpack.c.bf16 %v1245_v24, %v1229_v34 }
 0xa7c   :  { %v1256_v20 = vsel %vm140_vm2, %v1247_v10, %v1249_v37 }
 0xa7d   :  { %1673 = vmatprep.subr.bf16.mxu1 %v1672_v38  ;;  %v1259_v32 = vmul.f32 %v1256_v20, %v1953_v54 }
 0xa7e   :  { %1675 = vmatpush1.bf16.msra.mxu1 %v1674_v40 }
 0xa7f   :  { %v1265_v17 = vpop.permute.xlu1 %1264  ;;  %v1263_v59 = vpop.permute.xlu0 %1262 }
 0xa80   :  { %v1272_v36 = vsel %vm180_vm3, %v1263_v59, %v1265_v17 }
 0xa81   :  { %v1275_v35 = vmul.f32 %v1272_v36, %v1957_v55 }
 0xa83   :  { %v1269_v31 = vpop.permute.xlu1 %1268  ;;  %v1253_v3 = vpop.permute.xlu0 %1252  ;;  %v1660_v8 = vpack.c.bf16 %v1275_v35, %v1259_v32 }
 0xa84   :  { %v1273_v43 = vsel %vm180_vm3, %v1269_v31, %v1263_v59  ;;  %v1257_v60 = vsel %vm140_vm2, %v1253_v3, %v1247_v10 }
 0xa85   :  { %v1274_v4 = vmul.f32 %v1273_v43, %v1966_v62  ;;  %v1258_v45 = vmul.f32 %v1257_v60, %v1969_v63  ;;  %1661 = vmatprep.subr.bf16.mxu0 %v1660_v8 }
 0xa87   :  { %v1662_v52 = vpack.c.bf16 %v1274_v4, %v1258_v45  ;;  %v1267_v28 = vpop.permute.xlu1 %1266  ;;  %v1251_v39 = vpop.permute.xlu0 %1250 }
 0xa88   :  { %v1270_v54 = vsel %vm180_vm3, %v1267_v28, %v1269_v31  ;;  %v1271_v55 = vsel %vm180_vm3, %v1265_v17, %v1267_v28  ;;  %v1254_v11 = vsel %vm140_vm2, %v1251_v39, %v1253_v3  ;;  %v1255_v53 = vsel %vm140_vm2, %v1249_v37, %v1251_v39 }
 0xa89   :  { %v1276_v62 = vmul.f32 %v1271_v55, %v1976_v12  ;;  %v1277_v63 = vmul.f32 %v1270_v54, %v1979_v16  ;;  %v1260_v1 = vmul.f32 %v1255_v53, %v1987_v22  ;;  %v1261_v15 = vmul.f32 %v1254_v11, %v1990_v23  ;;  %1663 = vmatpush1.bf16.msra.mxu0 %v1662_v52 }
 0xa8b   :  { %v1678_v44 = vpack.c.bf16 %v1276_v62, %v1260_v1  ;;  %v1283_v57 = vpop.permute.xlu1 %1282  ;;  %v1281_v9 = vpop.permute.xlu0 %1280  ;;  %v1676_v13 = vpack.c.bf16 %v1277_v63, %v1261_v15  ;;  %v1342_v1 = vld [vmem:[%s2706_s11] sm:$0xff] }
 0xa8c   :  { %v1287_v14 = vsel %vm220_vm4, %v1281_v9, %v1283_v57 }
 0xa8d   :  { %v1291_v51 = vmul.f32 %v1287_v14, %v1994_v29  ;;  %1677 = vmatprep.subr.bf16.mxu1 %v1676_v13 }
 0xa8e   :  { %1679 = vmatpush1.bf16.msra.mxu1 %v1678_v44 }
 0xa8f   :  { %v1285_v21 = vpop.permute.xlu1 %1284  ;;  %v1279_v12 = vpop.permute.xlu0 %1278  ;;  %v1664_v16 = vpack.c.bf16 %v1291_v51, %v2502_v5 }
 0xa90   :  { %v1286_v22 = vsel %vm220_vm4, %v1283_v57, %v1285_v21  ;;  %v1288_v23 = vsel %vm220_vm4, %v1279_v12, %v1281_v9  ;;  %v1289_v25 = vsel %vm220_vm4, %v1285_v21, %v1279_v12 }
 0xa91   :  { %v1292_v24 = vmul.f32 %v1286_v22, %v2012_v48  ;;  %v1290_v61 = vmul.f32 %v1288_v23, %v2015_v49  ;;  %v1293_v29 = vmul.f32 %v1289_v25, %v2018_v50  ;;  %1665 = vmatprep.subr.bf16.mxu0 %v1664_v16 }
 0xa93   :  { %v1682_v34 = vpack.c.bf16 %v1292_v24, %v2518_v6  ;;  %v1666_v5 = vpack.c.bf16 %v1290_v61, %v2500_v58  ;;  %v1299_v40 = vpop.permute.xlu1 %1298  ;;  %v1297_v37 = vpop.permute.xlu0 %1296  ;;  %v1680_v10 = vpack.c.bf16 %v1293_v29, %v2512_v26 }
 0xa94   :  { %v1303_v38 = vsel %vm260_vm5, %v1297_v37, %v1299_v40 }
 0xa95   :  { %1667 = vmatpush1.bf16.msra.mxu0 %v1666_v5  ;;  %1681 = vmatprep.subr.bf16.mxu1 %v1680_v10  ;;  %v1307_v50 = vmul.f32 %v1303_v38, %v2041_v18 }
 0xa96   :  { %1683 = vmatpush1.bf16.msra.mxu1 %v1682_v34 }
 0xa97   :  { %v1315_v48 = vpop.permute.xlu1 %1314  ;;  %v1313_v20 = vpop.permute.xlu0 %1312 }
 0xa98   :  { %v1319_v49 = vsel %vm300_vm6, %v1313_v20, %v1315_v48 }
 0xa99   :  { %v1323_v6 = vmul.f32 %v1319_v49, %v2045_v19 }
 0xa9b   :  { %v1311_v58 = vpop.permute.xlu1 %1310  ;;  %v1295_v17 = vpop.permute.xlu0 %1294  ;;  %v1668_v59 = vpack.c.bf16 %v1323_v6, %v1307_v50 }
 0xa9c   :  { %v1320_v26 = vsel %vm300_vm6, %v1311_v58, %v1313_v20  ;;  %v1304_v36 = vsel %vm260_vm5, %v1295_v17, %v1297_v37  ;;  %v1508_v37 = vld [vmem:[%s2707_s12] sm:$0xff] }
 0xa9d   :  { %v1322_v32 = vmul.f32 %v1320_v26, %v2054_v30  ;;  %v1306_v35 = vmul.f32 %v1304_v36, %v2057_v33  ;;  %1669 = vmatprep.subr.bf16.mxu0 %v1668_v59 }
 0xa9f   :  { %v1670_v31 = vpack.c.bf16 %v1322_v32, %v1306_v35  ;;  %v1317_v3 = vpop.permute.xlu1 %1316  ;;  %v1301_v8 = vpop.permute.xlu0 %1300 }
 0xaa0   :  { %v1318_v18 = vsel %vm300_vm6, %v1315_v48, %v1317_v3  ;;  %v1321_v19 = vsel %vm300_vm6, %v1317_v3, %v1311_v58  ;;  %v1302_v43 = vsel %vm260_vm5, %v1299_v40, %v1301_v8  ;;  %v1305_v60 = vsel %vm260_vm5, %v1301_v8, %v1295_v17  ;;  %v1512_v48 = vld [vmem:[%s2708_s13] sm:$0xff] }
 0xaa1   :  { %v1324_v30 = vmul.f32 %v1318_v18, %v2064_v41  ;;  %v1325_v33 = vmul.f32 %v1321_v19, %v2067_v42  ;;  %v1308_v4 = vmul.f32 %v1302_v43, %v2075_v46  ;;  %v1309_v45 = vmul.f32 %v1305_v60, %v2078_v47  ;;  %1671 = vmatpush1.bf16.msra.mxu0 %v1670_v31 }
 0xaa3   :  { %v1686_v52 = vpack.c.bf16 %v1324_v30, %v1308_v4  ;;  %v1331_v28 = vpop.permute.xlu1 %1330  ;;  %v1329_v39 = vpop.permute.xlu0 %1328  ;;  %v1684_v54 = vpack.c.bf16 %v1325_v33, %v1309_v45 }
 0xaa4   :  { %v1335_v55 = vsel %vm340_vm7, %v1329_v39, %v1331_v28 }
 0xaa5   :  { %v1339_v11 = vmul.f32 %v1335_v55, %v2082_v56  ;;  %1685 = vmatprep.subr.bf16.mxu1 %v1684_v54 }
 0xaa6   :  { %1687 = vmatpush1.bf16.msra.mxu1 %v1686_v52 }
 0xaa7   :  { %v1333_v53 = vpop.permute.xlu1 %1332  ;;  %1362 = vmatprep.subr.mxu0 %v1339_v11  ;;  %v1327_v41 = vpop.permute.xlu0 %1326 }
 0xaa8   :  { %v1334_v42 = vsel %vm340_vm7, %v1331_v28, %v1333_v53  ;;  %v1336_v46 = vsel %vm340_vm7, %v1327_v41, %v1329_v39  ;;  %v1337_v47 = vsel %vm340_vm7, %v1333_v53, %v1327_v41 }
 0xaa9   :  { %v1340_v62 = vmul.f32 %v1334_v42, %v2106_v2  ;;  %v1338_v63 = vmul.f32 %v1336_v46, %v2100_v27  ;;  %v1341_v56 = vmul.f32 %v1337_v47, %v2103_v0 }
 0xaab   :  { %1363 = vmatpush1.msra.mxu0 %v1338_v63  ;;  %1433 = vmatprep.subr.mxu1 %v1341_v56 }
 0xaac   :  { %1558 = vmatmul.mubr.msk.f32.vlgmr.msra.gmra.mrb[6].mxu0 %vm373_vm8, %v1342_v1  ;;  %1434 = vmatpush1.msra.mxu1 %v1340_v62 }
 0xaad   :  { %1559 = vmatmul.mubr.msk.f32.vlgmr.msra.gmra.mrb[6].mxu1 %vm373_vm8, %v1342_v1 }
 0xb7f   :  { %v1412_v15 = vpop.f32.mrb[6].mxu0 }
 0xb80   :  { %v1414_v7 = vpop.f32.mrb[7].mxu0  ;;  %v1483_v44 = vpop.f32.mrb[6].mxu1 }
 0xb81   :  { %v1488_v57 = vadd.f32 %v1414_v7, %v1412_v15  ;;  %v1485_v2 = vpop.f32.mrb[7].mxu1 }
 0xb83   :  { %v1489_v9 = vadd.f32 %v1488_v57, %v1483_v44 }
 0xb85   :  { %v1490_v27 = vadd.f32 %v1489_v9, %v1485_v2 }
 0xb87   :  { %1491 = vadd.xlane.f32.xlu0 %v1490_v27 }
 0xc14   :  { %v1492_v0 = vpop.xlane.xlu0 %1491 }
 0xc15   :  { %v1493_v13 = vmul.f32 0.001953125, %v1492_v0 }
 0xc17   :  { %v1494_v14 = vsub.f32 %v1412_v15, %v1493_v13  ;;  %v1495_v51 = vsub.f32 %v1414_v7, %v1493_v13  ;;  %v1496_v21 = vsub.f32 %v1483_v44, %v1493_v13  ;;  %v1497_v12 = vsub.f32 %v1485_v2, %v1493_v13 }
 0xc19   :  { %v1498_v16 = vmul.f32 %v1494_v14, %v1494_v14  ;;  %v1499_v22 = vmul.f32 %v1495_v51, %v1495_v51  ;;  %v1500_v23 = vmul.f32 %v1496_v21, %v1496_v21  ;;  %v1501_v24 = vmul.f32 %v1497_v12, %v1497_v12 }
 0xc1b   :  { %v1502_v25 = vadd.f32 %v1499_v22, %v1498_v16 }
 0xc1d   :  { %v1503_v61 = vadd.f32 %v1502_v25, %v1500_v23 }
 0xc1f   :  { %v1504_v29 = vadd.f32 %v1503_v61, %v1501_v24 }
 0xc21   :  { %1505 = vadd.xlane.f32.xlu1 %v1504_v29 }
 0xcae   :  { %v1506_v34 = vpop.xlane.xlu1 %1505 }
 0xcaf   :  { %v1507_v5 = vmul.f32 0.001953125, %v1506_v34 }
 0xcb1   :  { %v1509_v40 = vadd.f32 1e-05, %v1507_v5 }
 0xcb3   :  { %1706 = vrsqrt.f32 %v1509_v40 }
 0xcbd   :  { %v1707_v10 = vpop.eup %1706 }
 0xcbe   :  { %v1511_v38 = vmul.f32 %v1707_v10, %v1508_v37 }
 0xcc0   :  { %1517 = vperm.xlu0 %1698, %v1511_v38   ;;  %v1513_v20 = vmul.f32 %v1511_v38, %v1493_v13 }
 0xcc2   :  { %v1514_v49 = vsub.f32 %v1512_v48, %v1513_v20 }
 0xcc4   :  { %1526 = vperm.xlu1 %1699, %v1514_v49  }
 0xd3f   :  { %v1518_v50 = vpop.permute.xlu0 %1517 }
 0xd40   :  { %v1520_v6 = vmul.f32 %v1518_v50, %v1412_v15  ;;  %v1521_v58 = vmul.f32 %v1518_v50, %v1414_v7  ;;  %v1522_v17 = vmul.f32 %v1518_v50, %v1483_v44  ;;  %v1523_v59 = vmul.f32 %v1518_v50, %v1485_v2 }
 0xd43   :  { %v1527_v26 = vpop.permute.xlu1 %1526 }
 0xd44   :  { %v1529_v36 = vadd.f32 %v1527_v26, %v1520_v6  ;;  %v1530_v32 = vadd.f32 %v1527_v26, %v1521_v58  ;;  %v1531_v35 = vadd.f32 %v1527_v26, %v1522_v17  ;;  %v1532_v31 = vadd.f32 %v1527_v26, %v1523_v59 }
 0xd46   :  { %v1533_v3 = vmax.f32 %v1529_v36, 0.0  ;;  %v1534_v8 = vmax.f32 %v1530_v32, 0.0  ;;  %v1535_v18 = vmax.f32 %v1531_v35, 0.0  ;;  %v1536_v19 = vmax.f32 %v1532_v31, 0.0 }
 0xd48   :  { %1537 = vst [vmem:[%s2709_s14] sm:$0xff] %v1533_v3  ;;  %1538 = vst [vmem:[%s2709_s14 + $0x8] sm:$0xff] %v1534_v8 }
 0xd49   :  { %1539 = vst [vmem:[%s2709_s14 + $0x10] sm:$0xff] %v1535_v18  ;;  %1540 = vst [vmem:[%s2709_s14 + $0x18] sm:$0xff] %v1536_v19 }

</bundles_post_ra>
